<compile_context>
chip_gen: v7x
topology: tpu7x:2x2x1
jax: 0.10.0
libtpu: 0.0.40
codegen_flags: <defaults>
</compile_context>

<pallas_src>
from functools import partial

import jax
import jax.numpy as jnp
from jax.experimental import pallas as pl
from jax.experimental.pallas import tpu as pltpu

NEG_INF = -1e30


def gat_edge_kernel(el_ref, shift_ref, er_ref, rhs_ref, adj_ref, bias_ref,
                    out_ref, *, num_heads, out_feats, negative_slope, fast):
    """Edge softmax + neighbour aggregation for one destination-row tile.

    el_ref:    (TILE_M, H)         f32   attn_l . h  for destination rows
    shift_ref: (TILE_M, H)         f32   leakyrelu(el + max_j er_j) upper bound
    er_ref:    (H, N)              f32   attn_r . h  for all source columns
    rhs_ref:   (N, H*(F+1))        f32/bf16  per-head blocks [h_h | 1]
    adj_ref:   (TILE_M, N)         bf16  {0,1} adjacency row tile
    bias_ref:  (1, H*F)            f32
    out_ref:   (TILE_M, H*F)       f32   lane-dense final layout
    """
    F = out_feats
    Fa = F + 1
    slope = jnp.float32(negative_slope)

    adj = adj_ref[...]                                   # (TM, N) bf16 {0,1}
    adj_m = adj if fast else adj.astype(jnp.float32)

    outs = []
    for hh in range(num_heads):                          # static, unrolled (H small)
        # edge logits + leaky relu, all in f32
        e = el_ref[:, hh:hh + 1] + er_ref[hh:hh + 1, :]  # (TM, N)
        if 0.0 <= negative_slope <= 1.0:
            e = jnp.maximum(e, slope * e)                # leakyrelu for slope in [0,1]
        else:
            e = jnp.where(e > 0, e, slope * e)
        x = e - shift_ref[:, hh:hh + 1]                  # <= 0 by construction (f32)

        if fast:
            # bf16 exp/mask chain (v6e/v7x native); p already in the MXU dtype
            p = jnp.exp(x.astype(jnp.bfloat16)) * adj_m  # (TM, N) bf16
        else:
            p = jnp.exp(x) * adj_m                       # (TM, N) f32

        # one MXU matmul gives the aggregate AND the softmax denominator
        res = jnp.dot(p, rhs_ref[:, hh * Fa:(hh + 1) * Fa],
                      preferred_element_type=jnp.float32)  # (TM, F+1)
        agg = res[:, :F]                                 # sum_j p_ij * h_j
        denom = res[:, F:Fa]                             # sum_j p_ij
        safe_denom = jnp.where(denom > 0.0, denom, 1.0)  # zero-degree rows -> bias only
        outs.append(agg * pl.reciprocal(safe_denom, approx=fast))

    # single unmasked 128-lane-wide store + one bias add for the whole tile
    out_ref[...] = jnp.concatenate(outs, axis=-1) + bias_ref[...]


def gat_conv_forward(row_ptr, col_ind, col_ptr, row_ind, permute, feat,
                     W, attn_l, attn_r, bias, num_heads, out_feats,
                     negative_slope=0.2, tile_rows=None, fast=True):
    """Inference forward of the dgNN GATConv module (residual=False, act=None).

    fast=True  -> bf16 exp/mask chain + bf16 MXU operands + approx reciprocal.
    fast=False -> pure f32 everywhere (parity path vs. the reference).
    """
    # col_ptr / row_ind / permute are only needed by the training-mode fused
    # kernel (GATConvFuse backward); feat_drop / attn_drop are eval no-ops.
    del col_ptr, row_ind, permute
    N, _ = feat.shape
    H, F = num_heads, out_feats
    Fa = F + 1
    nnz = col_ind.shape[0]

    # ---- projection + attention logits (plain XLA, like the torch part) ------
    h = jnp.dot(feat, W, preferred_element_type=jnp.float32)       # (N, H*F)
    h3 = h.reshape(N, H, F)
    el = jnp.sum(h3 * attn_l.reshape(1, H, F), axis=-1)            # (N, H) attn_row
    er = jnp.sum(h3 * attn_r.reshape(1, H, F), axis=-1)            # (N, H) attn_col
    er_t = er.T                                                    # (H, N)

    # Upper-bound stability shift (monotone leakyrelu, slope >= 0): exp args <= 0,
    # shift cancels exactly in the softmax ratio -> no in-kernel masked row-max.
    slope = jnp.float32(negative_slope)
    s = el + jnp.max(er, axis=0, keepdims=True)                    # (N, H)
    shift = jnp.where(s > 0, s, slope * s)                         # (N, H)

    # Per-head augmented rhs [h_h | 1] kept as one lane-dense 2-D array.
    rhs = jnp.concatenate([h3, jnp.ones((N, H, 1), jnp.float32)],
                          axis=-1).reshape(N, H * Fa)              # (N, H*(F+1))
    if fast:
        rhs = rhs.astype(jnp.bfloat16)

    # CSR -> dense {0,1} adjacency, bf16 (exactly representable, half the HBM).
    counts = row_ptr[1:] - row_ptr[:-1]
    row_id = jnp.repeat(jnp.arange(N), counts, total_repeat_length=nnz)
    adj = jnp.zeros((N, N), jnp.bfloat16).at[row_id, col_ind].set(1.0)

    bias2 = bias.reshape(1, H * F).astype(jnp.float32)

    # ---- generation-aware VMEM budget & destination-row tiling ----------------
    try:
        vmem_cap = int(pltpu.get_tpu_info().vmem_capacity_bytes)
        vmem_limit = min(int(vmem_cap * 0.8), 110 * 1024 * 1024)   # headroom on v7x
    except Exception:                                              # conservative fallback
        vmem_cap = 128 * 1024 * 1024
        vmem_limit = 64 * 1024 * 1024

    if tile_rows is None:
        cap = 1024 if vmem_cap >= (100 << 20) else 256             # big tiles on 128MiB parts
        bytes_per_row = max(1, N * 16)                             # adj stream + live temps
        tile_rows = min(cap, max(8, (vmem_limit // 2) // bytes_per_row))
        tile_rows = min(tile_rows, ((N + 7) // 8) * 8)
        if N >= 16:                                                # >= 2 grid steps (v7x megacore)
            tile_rows = min(tile_rows, ((N + 15) // 16) * 8)
    tile_rows = max(8, (int(tile_rows) // 8) * 8)
    num_tiles = (N + tile_rows - 1) // tile_rows
    n_pad = num_tiles * tile_rows

    if n_pad != N:                                                 # pad rows; no tile_rows=N cliff
        pad = n_pad - N
        el = jnp.pad(el, ((0, pad), (0, 0)))
        shift = jnp.pad(shift, ((0, pad), (0, 0)))
        adj = jnp.pad(adj, ((0, pad), (0, 0)))                     # padded rows: no edges

    kernel = partial(gat_edge_kernel, num_heads=H, out_feats=F,
                     negative_slope=float(negative_slope), fast=fast)

    out = pl.pallas_call(
        kernel,
        out_shape=jax.ShapeDtypeStruct((n_pad, H * F), jnp.float32),
        grid_spec=pltpu.PrefetchScalarGridSpec(
            num_scalar_prefetch=0,
            grid=(num_tiles,),
            in_specs=[
                pl.BlockSpec((tile_rows, H), lambda i: (i, 0)),    # el   (row tile)
                pl.BlockSpec((tile_rows, H), lambda i: (i, 0)),    # shift (row tile)
                pl.BlockSpec((H, N), lambda i: (0, 0)),            # er^T  (resident)
                pl.BlockSpec((N, H * Fa), lambda i: (0, 0)),       # rhs   (resident)
                pl.BlockSpec((tile_rows, N), lambda i: (i, 0)),    # adj   (streamed)
                pl.BlockSpec((1, H * F), lambda i: (0, 0)),        # bias  (resident)
            ],
            out_specs=pl.BlockSpec((tile_rows, H * F), lambda i: (i, 0)),
        ),
        compiler_params=pltpu.CompilerParams(
            dimension_semantics=("parallel",),
            vmem_limit_bytes=vmem_limit),
    )(el, shift, er_t, rhs, adj, bias2)

    return out[:N].reshape(N, H, F)                                # free reshape


def gat_reference(row_ptr, col_ind, feat, W, attn_l, attn_r, bias,
                  num_heads, out_feats, negative_slope):
    """Pure-JAX f32 reference matching the PyTorch module semantics (inference)."""
    N = feat.shape[0]
    h = (feat @ W).reshape(N, num_heads, out_feats)
    el = jnp.sum(attn_l * h, axis=-1)                              # (N, H)
    er = jnp.sum(attn_r * h, axis=-1)                              # (N, H)
    counts = row_ptr[1:] - row_ptr[:-1]
    row_id = jnp.repeat(jnp.arange(N), counts,
                        total_repeat_length=col_ind.shape[0])
    adj = jnp.zeros((N, N), jnp.float32).at[row_id, col_ind].set(1.0)
    e = el[:, None, :] + er[None, :, :]                            # (Ndst, Nsrc, H)
    e = jnp.where(e > 0, e, negative_slope * e)
    mask = adj[:, :, None] > 0
    e = jnp.where(mask, e, NEG_INF)
    e_max = jnp.max(e, axis=1, keepdims=True)
    p = jnp.where(mask, jnp.exp(e - e_max), 0.0)
    alpha = p / jnp.sum(p, axis=1, keepdims=True)
    rst = jnp.einsum('ijh,jhf->ihf', alpha, h)
    rst = rst + bias.reshape(1, num_heads, out_feats)
    return rst


if __name__ == "__main__":
    def ring_graph(n):
        # node i ~ {i-1, i, i+1} (mod n), CSR format, always has a self loop
        neighbors, indptr = [], [0]
        for i in range(n):
            nbrs = sorted({(i - 1) % n, i, (i + 1) % n})
            neighbors.extend(nbrs)
            indptr.append(len(neighbors))
        return (jnp.array(indptr, jnp.int32), jnp.array(neighbors, jnp.int32))

    def make_params(key, n, in_feats, heads, feats):
        k1, k2, k3, k4 = jax.random.split(key, 4)
        gain = 2.0 ** 0.5
        std_w = gain * (2.0 / (in_feats + feats * heads)) ** 0.5
        w = std_w * jax.random.normal(k1, (in_feats, feats * heads), jnp.float32)
        std_a = gain * (2.0 / (heads * feats + feats)) ** 0.5
        a_l = std_a * jax.random.normal(k2, (1, heads, feats), jnp.float32)
        a_r = std_a * jax.random.normal(k3, (1, heads, feats), jnp.float32)
        b = jnp.zeros((heads * feats,), jnp.float32)
        x = jax.random.normal(k4, (n, in_feats), jnp.float32)
        return w, a_l, a_r, b, x

    H, F = 4, 32            # H * F = 128 -> fully lane-dense output blocks
    neg_slope = 0.2

    # ---- case 1: N divisible by the tile --------------------------------------
    N, in_feats = 128, 32
    row_ptr, col_ind = ring_graph(N)
    permute = jnp.arange(col_ind.shape[0], dtype=jnp.int32)
    W, attn_l, attn_r, bias, feat = make_params(jax.random.PRNGKey(0), N, in_feats, H, F)

    ref = gat_reference(row_ptr, col_ind, feat, W, attn_l, attn_r, bias,
                        H, F, neg_slope)

    out_exact = gat_conv_forward(row_ptr, col_ind, row_ptr, col_ind, permute,
                                 feat, W, attn_l, attn_r, bias, H, F, neg_slope,
                                 tile_rows=32, fast=False)
    out_exact = jax.block_until_ready(out_exact)
    assert out_exact.shape == (N, H, F)
    assert jnp.allclose(out_exact, ref, atol=2e-4, rtol=2e-4), \
        "f32 kernel mismatch vs reference"

    out_fast = gat_conv_forward(row_ptr, col_ind, row_ptr, col_ind, permute,
                                feat, W, attn_l, attn_r, bias, H, F, neg_slope,
                                tile_rows=None, fast=True)
    out_fast = jax.block_until_ready(out_fast)
    assert out_fast.shape == (N, H, F)
    assert jnp.allclose(out_fast, ref, atol=3e-2, rtol=3e-2), \
        "bf16 fast kernel mismatch vs reference"

    # ---- case 2: N not divisible by the tile -> padded-grid path --------------
    N2, in2 = 96, 16
    row_ptr2, col_ind2 = ring_graph(N2)
    permute2 = jnp.arange(col_ind2.shape[0], dtype=jnp.int32)
    W2, al2, ar2, b2, feat2 = make_params(jax.random.PRNGKey(1), N2, in2, H, F)
    ref2 = gat_reference(row_ptr2, col_ind2, feat2, W2, al2, ar2, b2,
                         H, F, neg_slope)
    out2 = gat_conv_forward(row_ptr2, col_ind2, row_ptr2, col_ind2, permute2,
                            feat2, W2, al2, ar2, b2, H, F, neg_slope,
                            tile_rows=64, fast=False)   # 96 rows -> padded to 128
    out2 = jax.block_until_ready(out2)
    assert out2.shape == (N2, H, F)
    assert jnp.allclose(out2, ref2, atol=2e-4, rtol=2e-4), \
        "padded-grid kernel mismatch vs reference"

    print("KERNEL_OK")
</pallas_src>

<mosaic_0001>
module attributes {stable_mosaic.version = 11 : i64} {
  func.func @gat_edge_kernel(%arg0: i32, %arg1: memref<32x4xf32, #tpu.memory_space<vmem>>, %arg2: memref<32x4xf32, #tpu.memory_space<vmem>>, %arg3: memref<4x128xf32, #tpu.memory_space<vmem>>, %arg4: memref<128x132xf32, #tpu.memory_space<vmem>>, %arg5: memref<32x128xbf16, #tpu.memory_space<vmem>>, %arg6: memref<1x128xf32, #tpu.memory_space<vmem>>, %arg7: memref<32x128xf32, #tpu.memory_space<vmem>>) attributes {dimension_semantics = [#tpu.dimension_semantics<parallel>], iteration_bounds = array<i64: 4>, scalar_prefetch = 0 : i64, scratch_operands = 0 : i64, tpu.core_type = #tpu.core_type<tc>, window_params = [{transform_indices = @transform_0, window_bounds = array<i64: 32, 4>}, {transform_indices = @transform_1, window_bounds = array<i64: 32, 4>}, {pipeline_mode = #tpu.pipeline_mode<synchronous>, transform_indices = @transform_2, window_bounds = array<i64: 4, 128>}, {pipeline_mode = #tpu.pipeline_mode<synchronous>, transform_indices = @transform_3, window_bounds = array<i64: 128, 132>}, {transform_indices = @transform_4, window_bounds = array<i64: 32, 128>}, {pipeline_mode = #tpu.pipeline_mode<synchronous>, transform_indices = @transform_5, window_bounds = array<i64: 1, 128>}, {transform_indices = @transform_6, window_bounds = array<i64: 32, 128>}]} {
    %c0 = arith.constant 0 : index
    %c0_0 = arith.constant 0 : index
    %0 = vector.load %arg5[%c0, %c0_0] : memref<32x128xbf16, #tpu.memory_space<vmem>>, vector<32x128xbf16>
    %1 = arith.extf %0 : vector<32x128xbf16> to vector<32x128xf32>
    %c0_1 = arith.constant 0 : index
    %c0_2 = arith.constant 0 : index
    %2 = vector.load %arg1[%c0_1, %c0_2] : memref<32x4xf32, #tpu.memory_space<vmem>>, vector<32x1xf32>
    %c0_3 = arith.constant 0 : index
    %c0_4 = arith.constant 0 : index
    %3 = vector.load %arg3[%c0_3, %c0_4] : memref<4x128xf32, #tpu.memory_space<vmem>>, vector<1x128xf32>
    %4 = vector.broadcast %2 : vector<32x1xf32> to vector<32x128xf32>
    %5 = vector.broadcast %3 : vector<1x128xf32> to vector<32x128xf32>
    %6 = arith.addf %4, %5 : vector<32x128xf32>
    %cst = arith.constant 2.000000e-01 : f32
    %7 = vector.broadcast %cst : f32 to vector<32x128xf32>
    %8 = arith.mulf %7, %6 : vector<32x128xf32>
    %9 = arith.maximumf %6, %8 : vector<32x128xf32>
    %c0_5 = arith.constant 0 : index
    %c0_6 = arith.constant 0 : index
    %10 = vector.load %arg2[%c0_5, %c0_6] : memref<32x4xf32, #tpu.memory_space<vmem>>, vector<32x1xf32>
    %11 = vector.broadcast %10 : vector<32x1xf32> to vector<32x128xf32>
    %12 = arith.subf %9, %11 : vector<32x128xf32>
    %13 = math.exp %12 : vector<32x128xf32>
    %14 = arith.mulf %13, %1 : vector<32x128xf32>
    %c0_7 = arith.constant 0 : index
    %c0_8 = arith.constant 0 : index
    %15 = vector.load %arg4[%c0_7, %c0_8] : memref<128x132xf32, #tpu.memory_space<vmem>>, vector<128x33xf32>
    %cst_9 = arith.constant dense<0.000000e+00> : vector<32x33xf32>
    %16 = tpu.matmul %14, %15, %cst_9 {dimension_numbers = #tpu.dot_dimension_numbers<[1], [0], [0], [1], [0, 0, 1, 1], [], []>} : vector<32x128xf32>, vector<128x33xf32>, vector<32x33xf32> -> vector<32x33xf32>
    %17 = vector.extract_strided_slice %16 {offsets = [0, 0], sizes = [32, 32], strides = [1, 1]} : vector<32x33xf32> to vector<32x32xf32>
    %18 = vector.extract_strided_slice %16 {offsets = [0, 32], sizes = [32, 1], strides = [1, 1]} : vector<32x33xf32> to vector<32x1xf32>
    %cst_10 = arith.constant 0.000000e+00 : f32
    %19 = vector.broadcast %cst_10 : f32 to vector<32x1xf32>
    %20 = arith.cmpf ogt, %18, %19 : vector<32x1xf32>
    %cst_11 = arith.constant 1.000000e+00 : f32
    %21 = vector.broadcast %cst_11 : f32 to vector<32x1xf32>
    %22 = arith.select %20, %18, %21 : vector<32x1xi1>, vector<32x1xf32>
    %23 = tpu.reciprocal %22 : vector<32x1xf32> -> vector<32x1xf32>
    %24 = vector.broadcast %23 : vector<32x1xf32> to vector<32x32xf32>
    %25 = arith.mulf %17, %24 : vector<32x32xf32>
    %c0_12 = arith.constant 0 : index
    %c1 = arith.constant 1 : index
    %26 = vector.load %arg1[%c0_12, %c1] : memref<32x4xf32, #tpu.memory_space<vmem>>, vector<32x1xf32>
    %c1_13 = arith.constant 1 : index
    %c0_14 = arith.constant 0 : index
    %27 = vector.load %arg3[%c1_13, %c0_14] : memref<4x128xf32, #tpu.memory_space<vmem>>, vector<1x128xf32>
    %28 = vector.broadcast %26 : vector<32x1xf32> to vector<32x128xf32>
    %29 = vector.broadcast %27 : vector<1x128xf32> to vector<32x128xf32>
    %30 = arith.addf %28, %29 : vector<32x128xf32>
    %cst_15 = arith.constant 2.000000e-01 : f32
    %31 = vector.broadcast %cst_15 : f32 to vector<32x128xf32>
    %32 = arith.mulf %31, %30 : vector<32x128xf32>
    %33 = arith.maximumf %30, %32 : vector<32x128xf32>
    %c0_16 = arith.constant 0 : index
    %c1_17 = arith.constant 1 : index
    %34 = vector.load %arg2[%c0_16, %c1_17] : memref<32x4xf32, #tpu.memory_space<vmem>>, vector<32x1xf32>
    %35 = vector.broadcast %34 : vector<32x1xf32> to vector<32x128xf32>
    %36 = arith.subf %33, %35 : vector<32x128xf32>
    %37 = math.exp %36 : vector<32x128xf32>
    %38 = arith.mulf %37, %1 : vector<32x128xf32>
    %c0_18 = arith.constant 0 : index
    %c33 = arith.constant 33 : index
    %39 = vector.load %arg4[%c0_18, %c33] : memref<128x132xf32, #tpu.memory_space<vmem>>, vector<128x33xf32>
    %cst_19 = arith.constant dense<0.000000e+00> : vector<32x33xf32>
    %40 = tpu.matmul %38, %39, %cst_19 {dimension_numbers = #tpu.dot_dimension_numbers<[1], [0], [0], [1], [0, 0, 1, 1], [], []>} : vector<32x128xf32>, vector<128x33xf32>, vector<32x33xf32> -> vector<32x33xf32>
    %41 = vector.extract_strided_slice %40 {offsets = [0, 0], sizes = [32, 32], strides = [1, 1]} : vector<32x33xf32> to vector<32x32xf32>
    %42 = vector.extract_strided_slice %40 {offsets = [0, 32], sizes = [32, 1], strides = [1, 1]} : vector<32x33xf32> to vector<32x1xf32>
    %cst_20 = arith.constant 0.000000e+00 : f32
    %43 = vector.broadcast %cst_20 : f32 to vector<32x1xf32>
    %44 = arith.cmpf ogt, %42, %43 : vector<32x1xf32>
    %cst_21 = arith.constant 1.000000e+00 : f32
    %45 = vector.broadcast %cst_21 : f32 to vector<32x1xf32>
    %46 = arith.select %44, %42, %45 : vector<32x1xi1>, vector<32x1xf32>
    %47 = tpu.reciprocal %46 : vector<32x1xf32> -> vector<32x1xf32>
    %48 = vector.broadcast %47 : vector<32x1xf32> to vector<32x32xf32>
    %49 = arith.mulf %41, %48 : vector<32x32xf32>
    %c0_22 = arith.constant 0 : index
    %c2 = arith.constant 2 : index
    %50 = vector.load %arg1[%c0_22, %c2] : memref<32x4xf32, #tpu.memory_space<vmem>>, vector<32x1xf32>
    %c2_23 = arith.constant 2 : index
    %c0_24 = arith.constant 0 : index
    %51 = vector.load %arg3[%c2_23, %c0_24] : memref<4x128xf32, #tpu.memory_space<vmem>>, vector<1x128xf32>
    %52 = vector.broadcast %50 : vector<32x1xf32> to vector<32x128xf32>
    %53 = vector.broadcast %51 : vector<1x128xf32> to vector<32x128xf32>
    %54 = arith.addf %52, %53 : vector<32x128xf32>
    %cst_25 = arith.constant 2.000000e-01 : f32
    %55 = vector.broadcast %cst_25 : f32 to vector<32x128xf32>
    %56 = arith.mulf %55, %54 : vector<32x128xf32>
    %57 = arith.maximumf %54, %56 : vector<32x128xf32>
    %c0_26 = arith.constant 0 : index
    %c2_27 = arith.constant 2 : index
    %58 = vector.load %arg2[%c0_26, %c2_27] : memref<32x4xf32, #tpu.memory_space<vmem>>, vector<32x1xf32>
    %59 = vector.broadcast %58 : vector<32x1xf32> to vector<32x128xf32>
    %60 = arith.subf %57, %59 : vector<32x128xf32>
    %61 = math.exp %60 : vector<32x128xf32>
    %62 = arith.mulf %61, %1 : vector<32x128xf32>
    %c0_28 = arith.constant 0 : index
    %c66 = arith.constant 66 : index
    %63 = vector.load %arg4[%c0_28, %c66] : memref<128x132xf32, #tpu.memory_space<vmem>>, vector<128x33xf32>
    %cst_29 = arith.constant dense<0.000000e+00> : vector<32x33xf32>
    %64 = tpu.matmul %62, %63, %cst_29 {dimension_numbers = #tpu.dot_dimension_numbers<[1], [0], [0], [1], [0, 0, 1, 1], [], []>} : vector<32x128xf32>, vector<128x33xf32>, vector<32x33xf32> -> vector<32x33xf32>
    %65 = vector.extract_strided_slice %64 {offsets = [0, 0], sizes = [32, 32], strides = [1, 1]} : vector<32x33xf32> to vector<32x32xf32>
    %66 = vector.extract_strided_slice %64 {offsets = [0, 32], sizes = [32, 1], strides = [1, 1]} : vector<32x33xf32> to vector<32x1xf32>
    %cst_30 = arith.constant 0.000000e+00 : f32
    %67 = vector.broadcast %cst_30 : f32 to vector<32x1xf32>
    %68 = arith.cmpf ogt, %66, %67 : vector<32x1xf32>
    %cst_31 = arith.constant 1.000000e+00 : f32
    %69 = vector.broadcast %cst_31 : f32 to vector<32x1xf32>
    %70 = arith.select %68, %66, %69 : vector<32x1xi1>, vector<32x1xf32>
    %71 = tpu.reciprocal %70 : vector<32x1xf32> -> vector<32x1xf32>
    %72 = vector.broadcast %71 : vector<32x1xf32> to vector<32x32xf32>
    %73 = arith.mulf %65, %72 : vector<32x32xf32>
    %c0_32 = arith.constant 0 : index
    %c3 = arith.constant 3 : index
    %74 = vector.load %arg1[%c0_32, %c3] : memref<32x4xf32, #tpu.memory_space<vmem>>, vector<32x1xf32>
    %c3_33 = arith.constant 3 : index
    %c0_34 = arith.constant 0 : index
    %75 = vector.load %arg3[%c3_33, %c0_34] : memref<4x128xf32, #tpu.memory_space<vmem>>, vector<1x128xf32>
    %76 = vector.broadcast %74 : vector<32x1xf32> to vector<32x128xf32>
    %77 = vector.broadcast %75 : vector<1x128xf32> to vector<32x128xf32>
    %78 = arith.addf %76, %77 : vector<32x128xf32>
    %cst_35 = arith.constant 2.000000e-01 : f32
    %79 = vector.broadcast %cst_35 : f32 to vector<32x128xf32>
    %80 = arith.mulf %79, %78 : vector<32x128xf32>
    %81 = arith.maximumf %78, %80 : vector<32x128xf32>
    %c0_36 = arith.constant 0 : index
    %c3_37 = arith.constant 3 : index
    %82 = vector.load %arg2[%c0_36, %c3_37] : memref<32x4xf32, #tpu.memory_space<vmem>>, vector<32x1xf32>
    %83 = vector.broadcast %82 : vector<32x1xf32> to vector<32x128xf32>
    %84 = arith.subf %81, %83 : vector<32x128xf32>
    %85 = math.exp %84 : vector<32x128xf32>
    %86 = arith.mulf %85, %1 : vector<32x128xf32>
    %c0_38 = arith.constant 0 : index
    %c99 = arith.constant 99 : index
    %87 = vector.load %arg4[%c0_38, %c99] : memref<128x132xf32, #tpu.memory_space<vmem>>, vector<128x33xf32>
    %cst_39 = arith.constant dense<0.000000e+00> : vector<32x33xf32>
    %88 = tpu.matmul %86, %87, %cst_39 {dimension_numbers = #tpu.dot_dimension_numbers<[1], [0], [0], [1], [0, 0, 1, 1], [], []>} : vector<32x128xf32>, vector<128x33xf32>, vector<32x33xf32> -> vector<32x33xf32>
    %89 = vector.extract_strided_slice %88 {offsets = [0, 0], sizes = [32, 32], strides = [1, 1]} : vector<32x33xf32> to vector<32x32xf32>
    %90 = vector.extract_strided_slice %88 {offsets = [0, 32], sizes = [32, 1], strides = [1, 1]} : vector<32x33xf32> to vector<32x1xf32>
    %cst_40 = arith.constant 0.000000e+00 : f32
    %91 = vector.broadcast %cst_40 : f32 to vector<32x1xf32>
    %92 = arith.cmpf ogt, %90, %91 : vector<32x1xf32>
    %cst_41 = arith.constant 1.000000e+00 : f32
    %93 = vector.broadcast %cst_41 : f32 to vector<32x1xf32>
    %94 = arith.select %92, %90, %93 : vector<32x1xi1>, vector<32x1xf32>
    %95 = tpu.reciprocal %94 : vector<32x1xf32> -> vector<32x1xf32>
    %96 = vector.broadcast %95 : vector<32x1xf32> to vector<32x32xf32>
    %97 = arith.mulf %89, %96 : vector<32x32xf32>
    %98 = tpu.concatenate %25, %49, %73, %97 in 1 : vector<32x32xf32>, vector<32x32xf32>, vector<32x32xf32>, vector<32x32xf32> -> vector<32x128xf32>
    %c0_42 = arith.constant 0 : index
    %c0_43 = arith.constant 0 : index
    %99 = vector.load %arg6[%c0_42, %c0_43] : memref<1x128xf32, #tpu.memory_space<vmem>>, vector<1x128xf32>
    %100 = vector.broadcast %99 : vector<1x128xf32> to vector<32x128xf32>
    %101 = arith.addf %98, %100 : vector<32x128xf32>
    %c0_44 = arith.constant 0 : index
    %c0_45 = arith.constant 0 : index
    %102 = vector.load %arg7[%c0_44, %c0_45] : memref<32x128xf32, #tpu.memory_space<vmem>>, vector<32x128xf32>
    tpu.vector_store %arg7[%c0_44, %c0_45], %101 {strides = array<i32>} : memref<32x128xf32, #tpu.memory_space<vmem>>, vector<32x128xf32>,
    return
  }
  func.func @transform_0(%arg0: i32) -> (i32, i32) {
    %c0_i32 = arith.constant 0 : i32
    %c0_i32_0 = arith.constant 0 : i32
    return %arg0, %c0_i32 : i32, i32
  }
  func.func @transform_1(%arg0: i32) -> (i32, i32) {
    %c0_i32 = arith.constant 0 : i32
    %c0_i32_0 = arith.constant 0 : i32
    return %arg0, %c0_i32 : i32, i32
  }
  func.func @transform_2(%arg0: i32) -> (i32, i32) {
    %c0_i32 = arith.constant 0 : i32
    %c0_i32_0 = arith.constant 0 : i32
    %c0_i32_1 = arith.constant 0 : i32
    return %c0_i32, %c0_i32_0 : i32, i32
  }
  func.func @transform_3(%arg0: i32) -> (i32, i32) {
    %c0_i32 = arith.constant 0 : i32
    %c0_i32_0 = arith.constant 0 : i32
    %c0_i32_1 = arith.constant 0 : i32
    return %c0_i32, %c0_i32_0 : i32, i32
  }
  func.func @transform_4(%arg0: i32) -> (i32, i32) {
    %c0_i32 = arith.constant 0 : i32
    %c0_i32_0 = arith.constant 0 : i32
    return %arg0, %c0_i32 : i32, i32
  }
  func.func @transform_5(%arg0: i32) -> (i32, i32) {
    %c0_i32 = arith.constant 0 : i32
    %c0_i32_0 = arith.constant 0 : i32
    %c0_i32_1 = arith.constant 0 : i32
    return %c0_i32, %c0_i32_0 : i32, i32
  }
  func.func @transform_6(%arg0: i32) -> (i32, i32) {
    %c0_i32 = arith.constant 0 : i32
    %c0_i32_0 = arith.constant 0 : i32
    return %arg0, %c0_i32 : i32, i32
  }
}

</mosaic_0001>

<bundles_post_ra>
// kernel: tpu_custom_call.1
= control target key start
LH: loop header
LB: loop body
LE: loop exit
PB: predicated region body
PF: predicated region fallthrough
CT: control target
= control target key end

     0   :  { %s3525_s0 = inlined_call_operand.hbm [shape: f32[128,4], index: 0, kind: input, shape index: {}]   ;;  %s3526_s1 = inlined_call_operand.hbm [shape: f32[128,4], index: 1, kind: input, shape index: {}]   ;;  %s3527_s2 = inlined_call_operand.hbm [shape: f32[4,128], index: 2, kind: input, shape index: {}]   ;;  %s3528_s3 = inlined_call_operand.hbm [shape: f32[128,132], index: 3, kind: input, shape index: {}]   ;;  %s3529_s4 = inlined_call_operand.hbm [shape: bf16[128,128], index: 4, kind: input, shape index: {}]   ;;  %s3530_s5 = inlined_call_operand.hbm [shape: f32[1,128], index: 5, kind: input, shape index: {}]   ;;  %s3531_s6 = inlined_call_operand.hbm [shape: f32[128,128], index: 6, kind: output, shape index: {}]  }
   0x1   :  { %3552 = sst [smem:[#allocation25_spill]] %s3525_s0 }
   0x2   :  { %3553 = sst [smem:[#allocation26_spill]] %s3527_s2 }
   0x3   :  { %3554 = sst [smem:[#allocation27_spill]] %s3530_s5 }
   0x4   :  { %3555 = sst [smem:[#allocation28_spill]] %s3531_s6 }
   0x5   :  { %11 = vsyncpa [#allocation3], 0 }
   0x6   :  { %13 = vsyncpa [#allocation3 + $0x1], 0 }
   0x7   :  { %14 = vsyncpa [#allocation6], 0 }
   0x8   :  { %16 = vsyncpa [#allocation6 + $0x1], 0 }
   0x9   :  { %17 = vsyncpa [#allocation9], 0 }
   0xa   :  { %18 = vsyncpa [#allocation4], 0 }
   0xb   :  { %20 = vsyncpa [#allocation4 + $0x1], 0  ;;  %s2762_s21 = smov 0   ;;  %s2764_s22 = smov 0  }
   0xc   :  { %s2766_s23 = smov 0   ;;  %s2768_s24 = smov 0  }
   0xd LB: > { %3556 = sst [smem:[#allocation20_spill]] %s2687_s21  ;;  %s2783_s25 = sadd.s32 4294967295, %s2699_s24   ;;  %s2699_s24 = sphi %s2768_s24, %s3595_s24   ;;  %s2695_s23 = sphi %s2766_s23, %s3599_s23   ;;  %s2691_s22 = sphi %s2764_s22, %s3598_s22   ;;  %s2687_s21 = sphi %s2762_s21, %s3597_s21  }
   0xe   : > { %s1683_s26 = sadd.s32 4294967294, %s2699_s24   ;;  %p46_p0 = scmp.ne.s32.totalorder %s2691_s22, %s2687_s21 }
   0xf   : > { %p3532_p1 = scmp.eq.s32.totalorder %s2783_s25, 0  ;;  %p191_p3 = scmp.eq.s32.totalorder %s1683_s26, 3 }
  0x10   : > { %p1684_p5 = scmp.ge.s32.totalorder %s2699_s24, 1  ;;  %p198_p7 = scmp.lt.s32.totalorder %s2699_s24, 5 }
  0x11   : > { %p2792_p4 = por %p3532_p1, %p46_p0  ;;  %p2797_p6 = por %p191_p3, %p46_p0 }
  0x12   : > { %p2802_p8 = pnand %p1684_p5, %p198_p7  ;;  %s2701_s30 = smov [#allocation7]  }
  0x13   : > { %s3557_s27 = scalar_select %p2792_p4, 1, 0 }
  0x14   : > { %s3558_s28 = scalar_select %p2797_p6, 1, 0 }
  0x15   : > { %s3560_s29 = scalar_select %p2802_p8, 1, 0 }
  0x16   : > { %3559 = sst [smem:[#allocation21_spill]] %s3558_s28  ;;  %s211_s7 = sshll.u32 %s2701_s30, 4  ;;  %s212_s7 = int_to_ptr.vmem [resolvable:$true] %s211_s7 }
  0x17   : > { %p2109_p9 = pneg %p2802_p8  ;;  %s2702_s8 = smov [#allocation11]  }
  0x18   : > { %s235_s9 = sshll.u32 %s2702_s8, 4  ;;  %s2817_s11 = sadd.s32 1, %s2699_s24   ;;  %s2814_s9 = int_to_ptr.vmem [resolvable:$true] %s235_s9 }
  0x19   : > { %p2810_p10 = pnand %p2109_p9, %p3532_p1  ;;  %3562 = sst [smem:[#allocation22_spill]] %s2817_s11 }
  0x1a   : > { %s30_s12 = ssub.s32 %s2699_s24, %s2817_s11  ;;  %s3563_s2 = sld [smem:[#allocation26_spill]] }
  0x1b   : > { %s3561_s10 = scalar_select %p2810_p10, 1, 0 }
  0x1c   : > { %p2829_p12 = pneg %p2810_p10 }
  0x1e   : > { %s3564_s18 = scalar_select %p2829_p12, 1, 0 }
  0x20   : > { %s2439_s15 = scalar_lea.hbm %s3563_s2, 64 }
  0x21   : > { %p2440_p11 = scmp.ne.s32.totalorder %s3563_s2, %s2439_s15  ;;  %p2446_p3 = scmp.lt.u32.totalorder %s2439_s15, %s3563_s2 }
  0x23   : > { %p2442_p13 = pnand %p2829_p12, %p2440_p11 }
  0x25   : > { %p2443_p0 = pneg %p2442_p13 }
  0x27   : > { %p2448_p5 = pnand %p2446_p3, %p2443_p0 }
  0x29   : > { %2451 = shalt.err (!%p2448_p5)
}
  0x2a   : > { %s2452_s26 = scalar_lea.vmem %s212_s7, 64  ;;  %p2460_p2 = scmp.lt.s32.totalorder %s212_s7, %s212_s7 }
  0x2b   : > { %p2453_p7 = scmp.ne.s32.totalorder %s212_s7, %s2452_s26  ;;  %p2461_p6 = scmp.lt.s32.totalorder %s2452_s26, %s2452_s26 }
  0x2d   : > { %p2455_p9 = pnand %p2453_p7, %p2829_p12  ;;  %p2462_p4 = por %p2461_p6, %p2460_p2 }
  0x2f   : > { %p2456_p1 = pneg %p2455_p9 }
  0x31   : > { %p2463_p8 = pnand %p2462_p4, %p2456_p1 }
  0x33   : > { %2466 = shalt.err (!%p2463_p8)
}
  0x34   : > { %2112 = dma.hbm_to_vmem [thread:$0]  (!%p2810_p10), %s3563_s2, 64, %s212_s7, [#allocation6]  }
  0x35   : > { %s3565_s5 = sld [smem:[#allocation27_spill]] }
  0x3b   : > { %s2467_s15 = scalar_lea.hbm %s3565_s5, 16 }
  0x3c   : > { %p2468_p11 = scmp.ne.s32.totalorder %s3565_s5, %s2467_s15  ;;  %p2474_p1 = scmp.lt.u32.totalorder %s2467_s15, %s3565_s5 }
  0x3e   : > { %p2470_p13 = pnand %p2468_p11, %p2829_p12 }
  0x40   : > { %p2471_p2 = pneg %p2470_p13 }
  0x42   : > { %p2476_p4 = pnand %p2474_p1, %p2471_p2 }
  0x44   : > { %2479 = shalt.err (!%p2476_p4)
}
  0x45   : > { %s2480_s7 = scalar_lea.vmem %s2814_s9, 16  ;;  %s2487_s26 = scalar_lea.vmem %s2814_s9, 32 }
  0x46   : > { %p2481_p6 = scmp.ne.s32.totalorder %s2814_s9, %s2480_s7  ;;  %p2488_p3 = scmp.lt.s32.totalorder %s2814_s9, %s2814_s9 }
  0x47   : > { %p2489_p5 = scmp.lt.s32.totalorder %s2487_s26, %s2480_s7 }
  0x48   : > { %p2483_p8 = pnand %p2481_p6, %p2829_p12 }
  0x49   : > { %p2490_p7 = por %p2489_p5, %p2488_p3 }
  0x4a   : > { %p2484_p0 = pneg %p2483_p8 }
  0x4c   : > { %p2491_p9 = pnand %p2490_p7, %p2484_p0 }
  0x4e   : > { %2494 = shalt.err (!%p2491_p9)
}
  0x4f   : > { %2118 = dma.hbm_to_vmem [thread:$0]  (!%p2810_p10), %s3565_s5, 16, %s2814_s9, [#allocation6]  }
  0x50   : > { %p31_p11 = scmp.eq.s32.totalorder %s30_s12, 0  ;;  %s33_s13 = sadd.s32 1, %s2695_s23 }
  0x51   : > { %p40_p13 = scmp.ne.s32.totalorder %s2695_s23, %s2691_s22  ;;  %p41_p2 = scmp.eq.s32.totalorder %s2699_s24, 0 }
  0x52   : > { %s2877_s14 = scalar_select %p31_p11, %s2695_s23, %s33_s13  }
  0x53   : > { %p42_p1 = por %p41_p2, %p40_p13  ;;  %p3567_p4 = scmp.eq.s32.totalorder %s2783_s25, 3 }
  0x54   : > { %3566 = sst [smem:[#allocation23_spill]] %s2877_s14  ;;  %p2136_p8 = scmp.lt.s32.totalorder %s2699_s24, 4 }
  0x55   : > { %p2881_p6 = por %p3567_p4, %p40_p13  ;;  %s3537_s16 = sand.u32 1, %s2699_s24  }
  0x56   : > { %s3535_s17 = sand.u32 1, %s2695_s23   ;;  %s3536_s9 = sshll.u32 %s2699_s24, 9 }
  0x57   : > { %s3568_s15 = scalar_select %p2881_p6, 1, 0 }
  0x58   : > { %s2890_s19 = sshll.u32 %s3535_s17, 5  ;;  %s3570_s0 = sld [smem:[#allocation25_spill]] }
  0x59   : > { %3569 = sst [smem:[#allocation24_spill]] %s3568_s15  ;;  %s250_s26 = scalar_lea.vmem [#allocation2], %s2890_s19 }
  0x5a   : > { %s257_s30 = sshll.u32 %s250_s26, 4  ;;  %p2901_p0 = pnand %p2136_p8, %p42_p1  ;;  %s2905_s30 = int_to_ptr.vmem [resolvable:$true] %s257_s30 }
  0x5b   : > { %s2909_s13 = scalar_lea.sflag [#allocation3], %s3537_s16 }
  0x5c   : > { %s3571_s8 = scalar_select %p2901_p0, 1, 0 }
  0x5d   : > { %p2915_p5 = pneg %p2901_p0 }
  0x5e   : > { %s2898_s7 = scalar_lea.hbm %s3570_s0, %s3536_s9  ;;  %s2500_s9 = scalar_lea.hbm %s3570_s0, 2048 }
  0x5f   : > { %s2495_s17 = scalar_lea.hbm %s2898_s7, 512  ;;  %p2501_p11 = scmp.lt.u32.totalorder %s2898_s7, %s3570_s0 }
  0x60   : > { %p2496_p3 = scmp.ne.s32.totalorder %s2898_s7, %s2495_s17  ;;  %p2502_p13 = scmp.lt.u32.totalorder %s2500_s9, %s2495_s17 }
  0x61   : > { %p2504_p1 = scmp.lt.u32.totalorder %s2495_s17, %s2898_s7 }
  0x62   : > { %p2498_p7 = pnand %p2915_p5, %p2496_p3  ;;  %p2503_p2 = por %p2502_p13, %p2501_p11 }
  0x64   : > { %p2499_p9 = pneg %p2498_p7  ;;  %p2505_p4 = por %p2504_p1, %p2503_p2 }
  0x66   : > { %p2506_p8 = pnand %p2505_p4, %p2499_p9 }
  0x68   : > { %2509 = shalt.err (!%p2506_p8)
}
  0x69   : > { %s2510_s16 = scalar_lea.vmem %s2905_s30, 512  ;;  %s2703_s20 = smov [#allocation2]  }
  0x6a   : > { %p2511_p3 = scmp.ne.s32.totalorder %s2905_s30, %s2510_s16  ;;  %s2515_s26 = sshll.u32 %s2703_s20, 4  ;;  %s2516_s26 = int_to_ptr.vmem [resolvable:$false] %s2515_s26 }
  0x6b   : > { %s2517_s2 = scalar_lea.vmem %s2516_s26, 1024  ;;  %p2518_p10 = scmp.lt.s32.totalorder %s2905_s30, %s2516_s26 }
  0x6c   : > { %p2513_p7 = pnand %p2511_p3, %p2915_p5  ;;  %p2519_p12 = scmp.lt.s32.totalorder %s2517_s2, %s2510_s16 }
  0x6e   : > { %p2514_p6 = pneg %p2513_p7  ;;  %p2520_p11 = por %p2519_p12, %p2518_p10 }
  0x70   : > { %p2521_p13 = pnand %p2520_p11, %p2514_p6 }
  0x72   : > { %2524 = shalt.err (!%p2521_p13)
}
  0x73   : > { %s3549_s5 = smov 128   ;;  %s2705_s17 = smov 8  }
  0x74   : > { %2122 = dma.hbm_to_vmem [thread:$0]  (!%p2901_p0), %s2898_s7, 512, %s2905_s30, %s2909_s13, %s3549_s5, %s3549_s5, %s2705_s17  }
  0x75   : > { %s3573_s9 = sshll.u32 %s2699_s24, 9  ;;  %s271_s2 = scalar_lea.vmem [#allocation5], %s2890_s19 }
  0x76   : > { %s2947_s26 = scalar_lea.hbm %s3526_s1, %s3573_s9  ;;  %s278_s0 = sshll.u32 %s271_s2, 4  ;;  %s2950_s0 = int_to_ptr.vmem [resolvable:$true] %s278_s0 }
  0x77   : > { %s3574_s14 = sand.u32 1, %s2695_s23   ;;  %s2706_s28 = smov [#allocation8]  }
  0x78   : > { %s2954_s11 = sshll.u32 %s3574_s14, 4  ;;  %s221_s21 = sshll.u32 %s2706_s28, 4  ;;  %s222_s21 = int_to_ptr.vmem [resolvable:$true] %s221_s21 }
  0x79   : > { %s2525_s7 = scalar_lea.hbm %s3528_s3, 4096  ;;  %p3575_p12 = scmp.ne.s32.totalorder %s3564_s18, 0 }
  0x7a   : > { %p2526_p10 = scmp.ne.s32.totalorder %s3528_s3, %s2525_s7  ;;  %p2532_p2 = scmp.lt.u32.totalorder %s2525_s7, %s3528_s3 }
  0x7c   : > { %p2528_p6 = pnand %p2526_p10, %p3575_p12 }
  0x7e   : > { %p2529_p9 = pneg %p2528_p6 }
  0x80   : > { %p2534_p1 = pnand %p2532_p2, %p2529_p9 }
  0x82   : > { %2537 = shalt.err (!%p2534_p1)
}
  0x83   : > { %s2538_s14 = scalar_lea.vmem %s222_s21, 4096  ;;  %p2546_p7 = scmp.lt.s32.totalorder %s222_s21, %s222_s21 }
  0x84   : > { %p2539_p4 = scmp.ne.s32.totalorder %s222_s21, %s2538_s14  ;;  %p2547_p11 = scmp.lt.s32.totalorder %s2538_s14, %s2538_s14 }
  0x86   : > { %p2541_p8 = pnand %p2539_p4, %p3575_p12  ;;  %p2548_p13 = por %p2547_p11, %p2546_p7 }
  0x88   : > { %p2542_p3 = pneg %p2541_p8 }
  0x8a   : > { %p2549_p0 = pnand %p2548_p13, %p2542_p3 }
  0x8c   : > { %2552 = shalt.err (!%p2549_p0)
}
  0x8d   : > { %s2707_s6 = smov 256   ;;  %s2708_s28 = smov 16  }
  0x8e   : > { %p3576_p10 = scmp.ne.s32.totalorder %s3561_s10, 0  ;;  %s3577_s18 = sand.u32 1, %s2699_s24  }
  0x8f   : > { %s2976_s16 = scalar_lea.sflag [#allocation6], %s3577_s18  ;;  %s2553_s20 = scalar_lea.hbm %s2947_s26, 512 }
  0x90   : > { %2115 = dma.hbm_to_vmem [thread:$0]  (!%p3576_p10), %s3528_s3, 4096, %s222_s21, [#allocation9], %s2707_s6, %s2707_s6, %s2708_s28  }
  0x91   : > { %p2554_p12 = scmp.ne.s32.totalorder %s2947_s26, %s2553_s20  ;;  %s2558_s30 = scalar_lea.hbm %s3526_s1, 2048 }
  0x92   : > { %p2559_p9 = scmp.lt.u32.totalorder %s2947_s26, %s3526_s1  ;;  %p2560_p2 = scmp.lt.u32.totalorder %s2558_s30, %s2553_s20 }
  0x93   : > { %p2556_p0 = pnand %p2554_p12, %p2915_p5  ;;  %p2562_p4 = scmp.lt.u32.totalorder %s2553_s20, %s2947_s26 }
  0x94   : > { %p2561_p1 = por %p2560_p2, %p2559_p9 }
  0x95   : > { %p2557_p6 = pneg %p2556_p0 }
  0x96   : > { %p2563_p8 = por %p2562_p4, %p2561_p1 }
  0x98   : > { %p2564_p3 = pnand %p2563_p8, %p2557_p6 }
  0x9a   : > { %2567 = shalt.err (!%p2564_p3)
}
  0x9b   : > { %s2568_s21 = scalar_lea.vmem %s2950_s0, 512  ;;  %s2709_s10 = smov [#allocation5]  }
  0x9c   : > { %p2569_p7 = scmp.ne.s32.totalorder %s2950_s0, %s2568_s21  ;;  %s2573_s14 = sshll.u32 %s2709_s10, 4  ;;  %s2574_s14 = int_to_ptr.vmem [resolvable:$false] %s2573_s14 }
  0x9d   : > { %s2575_s6 = scalar_lea.vmem %s2574_s14, 1024  ;;  %p2576_p10 = scmp.lt.s32.totalorder %s2950_s0, %s2574_s14 }
  0x9e   : > { %p2571_p11 = pnand %p2569_p7, %p2915_p5  ;;  %p2577_p12 = scmp.lt.s32.totalorder %s2575_s6, %s2568_s21 }
  0xa0   : > { %p2572_p13 = pneg %p2571_p11  ;;  %p2578_p0 = por %p2577_p12, %p2576_p10 }
  0xa2   : > { %p2579_p9 = pnand %p2578_p0, %p2572_p13 }
  0xa4   : > { %2582 = shalt.err (!%p2579_p9)
}
  0xa5   : > { %p3578_p6 = scmp.ne.s32.totalorder %s3571_s8, 0  ;;  %s3579_s28 = smov 128  }
  0xa6   : > { %s1718_s15 = sshll.u32 %s2699_s24, 8  ;;  %s292_s5 = scalar_lea.vmem [#allocation10], %s2954_s11 }
  0xa7   : > { %2125 = dma.hbm_to_vmem [thread:$0]  (!%p3578_p6), %s2947_s26, 512, %s2950_s0, %s2976_s16, %s3579_s28, %s3579_s28, %s2705_s17  }
  0xa8   : > { %s299_s18 = sshll.u32 %s292_s5, 4  ;;  %s3008_s7 = scalar_lea.hbm %s3529_s4, %s1718_s15  ;;  %s3010_s18 = int_to_ptr.vmem [resolvable:$true] %s299_s18 }
  0xa9   : > { %s2583_s30 = scalar_lea.hbm %s3008_s7, 256  ;;  %s2588_s11 = scalar_lea.hbm %s3529_s4, 1024 }
  0xaa   : > { %p2584_p2 = scmp.ne.s32.totalorder %s3008_s7, %s2583_s30  ;;  %p2589_p8 = scmp.lt.u32.totalorder %s3008_s7, %s3529_s4 }
  0xab   : > { %p2590_p3 = scmp.lt.u32.totalorder %s2588_s11, %s2583_s30  ;;  %p2592_p11 = scmp.lt.u32.totalorder %s2583_s30, %s3008_s7 }
  0xac   : > { %p2586_p1 = pnand %p2584_p2, %p2915_p5 }
  0xad   : > { %p2591_p7 = por %p2590_p3, %p2589_p8 }
  0xae   : > { %p2587_p4 = pneg %p2586_p1 }
  0xaf   : > { %p2593_p13 = por %p2592_p11, %p2591_p7 }
  0xb1   : > { %p2594_p10 = pnand %p2593_p13, %p2587_p4 }
  0xb3   : > { %2597 = shalt.err (!%p2594_p10)
}
  0xb4   : > { %s2598_s19 = scalar_lea.vmem %s3010_s18, 256  ;;  %s2710_s9 = smov [#allocation10]  }
  0xb5   : > { %p2599_p12 = scmp.ne.s32.totalorder %s3010_s18, %s2598_s19  ;;  %s2603_s21 = sshll.u32 %s2710_s9, 4  ;;  %s2604_s21 = int_to_ptr.vmem [resolvable:$false] %s2603_s21 }
  0xb6   : > { %s2605_s10 = scalar_lea.vmem %s2604_s21, 512  ;;  %p2606_p2 = scmp.lt.s32.totalorder %s3010_s18, %s2604_s21 }
  0xb7   : > { %p2601_p0 = pnand %p2599_p12, %p2915_p5  ;;  %p2607_p1 = scmp.lt.s32.totalorder %s2605_s10, %s2598_s19 }
  0xb9   : > { %p2602_p9 = pneg %p2601_p0  ;;  %p2608_p8 = por %p2607_p1, %p2606_p2 }
  0xbb   : > { %p2609_p3 = pnand %p2608_p8, %p2602_p9 }
  0xbd   : > { %2612 = shalt.err (!%p2609_p3)
}
  0xbe   : > { %s2711_s14 = smov 64   ;;  %s2712_s6 = smov 4  }
  0xbf   : > { %2128 = dma.hbm_to_vmem [thread:$0]  (!%p3578_p6), %s3008_s7, 256, %s3010_s18, %s2909_s13, %s2711_s14, %s2711_s14, %s2712_s6  }
  0xc0   : > { %p3580_p5 = scmp.ne.s32.totalorder %s3560_s29, 0 }
  0xc1   : > { %s313_s12 = sand.u32 (!%p3580_p5), 1, %s2783_s25   ;;  %s3038_s28 = sand.u32 (!%p3580_p5), 1, %s2691_s22  }
  0xc2   : > { %311 = sbr.rel (%p3580_p5) target bundleno = 1004 (0x3ec), region = 44  ;;  %s3041_s15 = sshll.u32 (!%p3580_p5), %s3038_s28, 5 }
  0xc3   : > { %s314_s5 = scalar_lea.sflag (!%p3580_p5), [#allocation3], %s313_s12  ;;  %s3044_s20 = scalar_lea.vmem (!%p3580_p5), [#allocation2], %s3041_s15 }
  0xc4   : > { %p3581_p4 = scmp.ne.s32.totalorder (!%p3580_p5), %s3557_s27, 0 }
  0xc9   : > { %2658 = dma.done.wait (%p3581_p4), %s314_s5, 512  }
  0xca   : > { %2660 = vsyncadd (%p3581_p4), %s314_s5, 4294966784  ;;  %s323_s29 = scalar_lea.sflag [#allocation6], %s313_s12  ;;  %s3051_s8 = scalar_lea.vmem [#allocation5], %s3041_s15 }
  0xcb   : > { %2662 = dma.done.wait (%p3581_p4), %s323_s29, 512  }
  0xcc   : > { %2664 = vsyncadd (%p3581_p4), %s323_s29, 4294966784  ;;  %p3582_p6 = scmp.eq.s32.totalorder %s2783_s25, 0 }
  0xce   : > { %2666 = dma.done.wait (%p3582_p6), [#allocation6], 64   ;;  %p3583_p7 = pmov %p3582_p6 }
  0xcf   : > { %p3584_p11 = pmov %p3582_p6 }
  0xd0   : > { %2668 = vsyncadd (%p3583_p7), [#allocation6], 4294967232 }
  0xd1   : > { %2670 = dma.done.wait (%p3584_p11), [#allocation9], 4096   ;;  %p3585_p13 = pmov %p3582_p6 }
  0xd2   : > { %s1703_s13 = sshll.u32 %s3038_s28, 4 }
  0xd3   : > { %2672 = vsyncadd (%p3585_p13), [#allocation9], 4294963200  ;;  %s3066_s18 = scalar_lea.vmem [#allocation10], %s1703_s13 }
  0xd4   : > { %2674 = dma.done.wait (%p3581_p4), %s314_s5, 256  }
  0xd5   : > { %2676 = vsyncadd (%p3581_p4), %s314_s5, 4294967040  ;;  %p3586_p10 = pmov %p3582_p6 }
  0xd6   : > { %p3587_p12 = pmov %p3582_p6 }
  0xd7   : > { %2678 = dma.done.wait (%p3586_p10), [#allocation6], 16  }
  0xd8   : > { %2680 = vsyncadd (%p3587_p12), [#allocation6], 4294967280  ;;  %v2713_v0 = vmov 0   ;;  %v3079_v1 = vld [vmem:[%s3044_s20 + $0x8] sm:$0xff]  ;;  %v3083_v3 = vld [vmem:[#allocation8 + $0x10] sm:$0xff]  ;;  %s2714_s27 = smov 95  }
  0xd9   : > { %2201 = vset.pattern.permute.xlu1 %v2713_v0  ;;  %2200 = vset.pattern.permute.xlu0 %v2713_v0  ;;  %v3081_v2 = vld [vmem:[#allocation8] sm:$0xff]  ;;  %v3099_v8 = vld [vmem:[#allocation8 + $0x30] sm:$0xff]  ;;  %v2715_v9 = vmov 1   ;;  %v1168_v37 = vld [vmem:[#allocation8 + $0x18] sm:$0xff]  ;;  %s2716_s2 = smov 62   ;;  %s2717_s7 = smov 29  }
  0xda   : > { %410 = vperm.xlu1 %2201, %v3079_v1   ;;  %v3088_v4 = vpack.i.bf16 %v3083_v3, %v3081_v2  ;;  %v1961_v5 = vpack.c.bf16 %v3083_v3, %v3081_v2  ;;  %v3095_v6 = vld [vmem:[%s3044_s20] sm:$0xff]  ;;  %v3112_v13 = vld [vmem:[#allocation8 + $0x50] sm:$0xff]  ;;  %v3115_v14 = vld [vmem:[%s3051_s8 + $0x8] sm:$0xff]  ;;  %v2252_v40 = vpack.i.bf16 %v1168_v37, %v3083_v3  ;;  %v2718_v46 = vmov 3   ;;  %s2721_s30 = smov 32   ;;  %s2722_s0 = smov 64  }
  0xdb   : > { %v3097_v7 = vld [vmem:[#allocation8 + $0x20] sm:$0xff]  ;;  %v3119_v16 = vld [vmem:[#allocation8 + $0x70] sm:$0xff]  ;;  %v1166_v43 = vld [vmem:[#allocation8 + $0x8] sm:$0xff]  ;;  %v2719_v48 = vmov 2   ;;  %vm1293_vm0 = vcmask 236544   ;;  %s2723_s17 = smov 96  }
  0xdc   : > { %2196 = vrot.lane.b32.xlu0 %v3088_v4, %s2714_s27  ;;  %1962 = vmatprep.subr.bf16.mxu0 %v1961_v5  ;;  %v3105_v10 = vpack.i.bf16 %v3099_v8, %v3097_v7  ;;  %v1965_v11 = vpack.c.bf16 %v3099_v8, %v3097_v7  ;;  %v3110_v12 = vld [vmem:[#allocation8 + $0x40] sm:$0xff]  ;;  %v3137_v21 = vld [vmem:[#allocation8 + $0xb0] sm:$0xff]  ;;  %v2247_v44 = vpack.i.bf16 %v1166_v43, %v3081_v2  ;;  %v1174_v45 = vld [vmem:[#allocation8 + $0x48] sm:$0xff]  ;;  %s385_s11 = scalar_lea.vmem [#allocation12], %s3041_s15  ;;  %s1719_s16 = sshll.u32 %s2783_s25, 9 }
  0xdd   : > { %1964 = vmatpush3.bf16.msra.mxu0 %v1961_v5  ;;  %v3117_v15 = vld [vmem:[#allocation8 + $0x60] sm:$0xff]  ;;  %v3125_v17 = vpack.i.bf16 %v3112_v13, %v3110_v12  ;;  %v1969_v18 = vpack.c.bf16 %v3112_v13, %v3110_v12  ;;  %v3154_v26 = vld [vmem:[#allocation8 + $0xf0] sm:$0xff]  ;;  %v2285_v47 = vpack.i.bf16 %v1174_v45, %v3110_v12  ;;  %v1170_v49 = vld [vmem:[#allocation8 + $0x28] sm:$0xff]  ;;  %s1539_s26 = sshll.u32 %s385_s11, 4  ;;  %s3588_s19 = sld [smem:[#allocation24_spill]]  ;;  %s3474_s26 = int_to_ptr.vmem [resolvable:$true] %s1539_s26 }
  0xde   : > { %2202 = vset.pattern.permute.xlu1 %v2715_v9  ;;  %1966 = vmatprep.subr.bf16.mxu0 %v1965_v11  ;;  %v3132_v19 = vpack.i.bf16 %v3119_v16, %v3117_v15  ;;  %v3135_v20 = vld [vmem:[#allocation8 + $0xa0] sm:$0xff]  ;;  %v1973_v22 = vpack.c.bf16 %v3119_v16, %v3117_v15  ;;  %v3158_v28 = vld [vmem:[#allocation8 + $0x90] sm:$0xff]  ;;  %v2263_v50 = vpack.i.bf16 %v1170_v49, %v3097_v7  ;;  %v1172_v51 = vld [vmem:[#allocation8 + $0x38] sm:$0xff]  ;;  %s3589_s21 = sld [smem:[#allocation28_spill]]  ;;  %s1526_s6 = scalar_lea.sflag [#allocation4], %s3038_s28 }
  0xdf   : > { %618 = vperm.xlu1 %2202, %v3095_v6   ;;  %v3146_v23 = vld [vmem:[%s3051_s8] sm:$0xff]  ;;  %v3150_v24 = vpack.i.bf16 %v3137_v21, %v3135_v20  ;;  %v1981_v31 = vpack.c.bf16 %v3137_v21, %v3135_v20  ;;  %v3176_v32 = vld [vmem:[%s3044_s20 + $0x18] sm:$0xff]  ;;  %v400_v41 = vld [vmem:[%s3044_s20 + $0x10] sm:$0xff]  ;;  %v2268_v52 = vpack.i.bf16 %v1172_v51, %v3099_v8  ;;  %s2613_s12 = scalar_lea.vmem %s3474_s26, 512  ;;  %s2724_s15 = smov [#allocation12]  }
  0xe0   : > { %405 = vperm.xlu0 %2200, %v3095_v6   ;;  %v3152_v25 = vld [vmem:[#allocation8 + $0xe0] sm:$0xff]  ;;  %v3180_v34 = vld [vmem:[#allocation8 + $0xd0] sm:$0xff]  ;;  %v1180_v54 = vld [vmem:[#allocation8 + $0x78] sm:$0xff]  ;;  %p2614_p0 = scmp.ne.s32.totalorder %s3474_s26, %s2613_s12  ;;  %s2617_s5 = sshll.u32 %s2724_s15, 4  ;;  %s2618_s5 = int_to_ptr.vmem [resolvable:$false] %s2617_s5 }
  0xe1   : > { %1968 = vmatpush3.bf16.msra.mxu0 %v1965_v11  ;;  %v3156_v27 = vld [vmem:[#allocation8 + $0x80] sm:$0xff]  ;;  %v3167_v30 = vpack.i.bf16 %v3154_v26, %v3152_v25  ;;  %v1989_v38 = vpack.c.bf16 %v3154_v26, %v3152_v25  ;;  %v3207_v42 = vld [vmem:[%s3051_s8 + $0x10] sm:$0xff]  ;;  %v442_v53 = vld [vmem:[%s3051_s8 + $0x18] sm:$0xff]  ;;  %v2306_v55 = vpack.i.bf16 %v1180_v54, %v3119_v16  ;;  %s2619_s20 = scalar_lea.vmem %s2618_s5, 1024  ;;  %p2620_p8 = scmp.lt.s32.totalorder %s3474_s26, %s2618_s5 }
  0xe2   : > { %1970 = vmatprep.subr.bf16.mxu0 %v1969_v18  ;;  %v1977_v29 = vpack.c.bf16 %v3158_v28, %v3156_v27  ;;  %v3178_v33 = vld [vmem:[#allocation8 + $0xc0] sm:$0xff]  ;;  %v3188_v36 = vpack.i.bf16 %v3158_v28, %v3156_v27  ;;  %v1184_v56 = vld [vmem:[#allocation8 + $0x98] sm:$0xff]  ;;  %v1186_v58 = vld [vmem:[#allocation8 + $0xa8] sm:$0xff]  ;;  %p2621_p3 = scmp.lt.s32.totalorder %s2619_s20, %s2613_s12 }
  0xe3   : > { %2204 = vrot.lane.b32.xlu1 %v3105_v10, %s2714_s27  ;;  %v1985_v35 = vpack.c.bf16 %v3180_v34, %v3178_v33  ;;  %v3198_v39 = vpack.i.bf16 %v3180_v34, %v3178_v33  ;;  %v2323_v57 = vpack.i.bf16 %v1184_v56, %v3158_v28  ;;  %v1176_v59 = vld [vmem:[#allocation8 + $0x58] sm:$0xff]  ;;  %v2333_v60 = vpack.i.bf16 %v1186_v58, %v3135_v20  ;;  %v1178_v2 = vld [vmem:[#allocation8 + $0x68] sm:$0xff]  ;;  %p3591_p9 = scmp.ne.s32.totalorder %s3588_s19, 0 }
  0xe4   : > { %450 = vperm.xlu0 %2200, %v3115_v14   ;;  %2213 = vset.pattern.permute.xlu1 %v2713_v0  ;;  %v2290_v61 = vpack.i.bf16 %v1176_v59, %v3112_v13  ;;  %v1192_v62 = vld [vmem:[#allocation8 + $0xd8] sm:$0xff]  ;;  %v2301_v3 = vpack.i.bf16 %v1178_v2, %v3117_v15  ;;  %v1182_v8 = vld [vmem:[#allocation8 + $0x88] sm:$0xff]  ;;  %s3590_s10 = smov %s3589_s21  ;;  %s3482_s14 = scalar_lea.hbm %s3589_s21, %s1719_s16 }
  0xe5   : > { %1972 = vmatpush3.bf16.msra.mxu0 %v1969_v18  ;;  %v2353_v63 = vpack.i.bf16 %v1192_v62, %v3180_v34  ;;  %v2318_v11 = vpack.i.bf16 %v1182_v8, %v3156_v27  ;;  %v1188_v15 = vld [vmem:[#allocation8 + $0xb8] sm:$0xff]  ;;  %v1190_v28 = vld [vmem:[#allocation8 + $0xc8] sm:$0xff]  ;;  %p2615_p2 = pnand %p2614_p0, %p3591_p9  ;;  %p2622_p5 = por %p2621_p3, %p2620_p8 }
  0xe6   : > { %1974 = vmatprep.subr.bf16.mxu0 %v1973_v22  ;;  %v3275_v20 = vld [vmem:[#allocation7 + $0x1] ss:$0 sm:$0xff] }
  0xe7   : > { %2209 = vrot.lane.b32.xlu1 %v3125_v17, %s2714_s27  ;;  %p2616_p1 = pneg %p2615_p2 }
  0xe8   : > { %2216 = vrot.lane.b32.xlu0 %v3132_v19, %s2714_s27 }
  0xe9   : > { %1976 = vmatpush3.bf16.msra.mxu0 %v1973_v22  ;;  %p2623_p4 = pnand %p2622_p5, %p2616_p1 }
  0xea   : > { %1978 = vmatprep.subr.bf16.mxu0 %v1977_v29 }
  0xeb   : > { %445 = vperm.xlu1 %2213, %v3146_v23  }
  0xec   : > { %2226 = vrot.lane.b32.xlu0 %v3150_v24, %s2714_s27 }
  0xed   : > { %1980 = vmatpush3.bf16.msra.mxu0 %v1977_v29 }
  0xee   : > { %1982 = vmatprep.subr.bf16.mxu0 %v1981_v31 }
  0xef   : > { %2214 = vset.pattern.permute.xlu1 %v2715_v9 }
  0xf0   : > { %650 = vperm.xlu1 %2214, %v3146_v23   ;;  %2236 = vrot.lane.b32.xlu0 %v3167_v30, %s2714_s27 }
  0xf1   : > { %1984 = vmatpush3.bf16.msra.mxu0 %v1981_v31 }
  0xf2   : > { %1986 = vmatprep.subr.bf16.mxu0 %v1985_v35 }
  0xf4   : > { %654 = vperm.xlu1 %2214, %v3115_v14   ;;  %420 = vperm.xlu0 %2200, %v3176_v32  }
  0xf5   : > { %1988 = vmatpush3.bf16.msra.mxu0 %v1985_v35 }
  0xf6   : > { %1990 = vmatprep.subr.bf16.mxu0 %v1989_v38 }
  0xf8   : > { %2221 = vrot.lane.b32.xlu1 %v3188_v36, %s2714_s27  ;;  %2243 = vrot.lane.b32.xlu0 %v3088_v4, %s2716_s2 }
  0xf9   : > { %2240 = vset.pattern.permute.xlu1 %v2713_v0  ;;  %1992 = vmatpush3.bf16.msra.mxu0 %v1989_v38 }
  0xfc   : > { %2231 = vrot.lane.b32.xlu1 %v3198_v39, %s2714_s27  ;;  %2253 = vrot.lane.b32.xlu0 %v2252_v40, %s2717_s7 }
 0x100   : > { %415 = vperm.xlu1 %2240, %v400_v41   ;;  %455 = vperm.xlu0 %2200, %v3207_v42  }
 0x104   : > { %2241 = vset.pattern.permute.xlu1 %v2715_v9  ;;  %2273 = vset.pattern.permute.xlu0 %v2715_v9 }
 0x105   : > { %626 = vperm.xlu1 %2241, %v400_v41   ;;  %622 = vperm.xlu0 %2273, %v3079_v1  }
 0x109   : > { %2248 = vrot.lane.b32.xlu1 %v2247_v44, %s2717_s7  ;;  %658 = vperm.xlu0 %2273, %v3207_v42  }
 0x10d   : > { %630 = vperm.xlu1 %2241, %v3176_v32   ;;  %2276 = vset.pattern.permute.xlu0 %v2718_v46 }
 0x10e   : > { %1102 = vperm.xlu0 %2276, %v3095_v6  }
 0x111   : > { %2257 = vset.pattern.permute.xlu1 %v2719_v48 }
 0x112   : > { %872 = vperm.xlu1 %2257, %v3079_v1   ;;  %2286 = vrot.lane.b32.xlu0 %v2285_v47, %s2717_s7 }
 0x116   : > { %2259 = vrot.lane.b32.xlu1 %v3105_v10, %s2716_s2  ;;  %1138 = vperm.xlu0 %2276, %v3115_v14  }
 0x117   : > { %2274 = vset.pattern.permute.xlu1 %v2718_v46 }
 0x11a   : > { %2264 = vrot.lane.b32.xlu1 %v2263_v50, %s2717_s7  ;;  %2295 = vset.pattern.permute.xlu0 %v2719_v48 }
 0x11b   : > { %868 = vperm.xlu0 %2295, %v3095_v6  }
 0x11e   : > { %2269 = vrot.lane.b32.xlu1 %v2268_v52, %s2717_s7 }
 0x11f   : > { %880 = vperm.xlu0 %2295, %v3176_v32  }
 0x122   : > { %1106 = vperm.xlu1 %2274, %v3079_v1  }
 0x123   : > { %900 = vperm.xlu0 %2295, %v3146_v23  }
 0x126   : > { %2275 = vset.pattern.permute.xlu1 %v2713_v0  ;;  %v1194_v0 = vld [vmem:[#allocation8 + $0xe8] sm:$0xff] }
 0x127   : > { %460 = vperm.xlu1 %2275, %v442_v53   ;;  %904 = vperm.xlu0 %2295, %v3115_v14   ;;  %v2363_v1 = vpack.i.bf16 %v1194_v0, %v3152_v25 }
 0x12b   : > { %2277 = vset.pattern.permute.xlu1 %v2715_v9  ;;  %2307 = vrot.lane.b32.xlu0 %v2306_v55, %s2717_s7  ;;  %v3266_v9 = vld [vmem:[#allocation7] ss:$0 sm:$0xff] }
 0x12c   : > { %662 = vperm.xlu1 %2277, %v442_v53  }
 0x12f   : > { %912 = vperm.xlu0 %2295, %v442_v53  }
 0x130   : > { %2278 = vset.pattern.permute.xlu1 %v2719_v48 }
 0x131   : > { %876 = vperm.xlu1 %2278, %v400_v41  }
 0x133   : > { %2314 = vrot.lane.b32.xlu0 %v3188_v36, %s2716_s2  ;;  %v2348_v36 = vpack.i.bf16 %v1190_v28, %v3178_v33 }
 0x135   : > { %2280 = vrot.lane.b32.xlu1 %v3125_v17, %s2716_s2 }
 0x136   : > { %2284 = vset.pattern.permute.xlu1 %v2718_v46 }
 0x137   : > { %2324 = vrot.lane.b32.xlu0 %v2323_v57, %s2717_s7  ;;  %v1721_v57 = vld [vmem:[%s3066_s18] sm:$0xff]  }
 0x139   : > { %1110 = vperm.xlu1 %2284, %v400_v41  }
 0x13b   : > { %2334 = vrot.lane.b32.xlu0 %v2333_v60, %s2717_s7  ;;  %v3290_v60 = vunpack.c.l.bf16 %v1721_v57 }
 0x13d   : > { %2291 = vrot.lane.b32.xlu1 %v2290_v61, %s2717_s7  ;;  %v3292_v61 = vunpack.c.h.bf16 %v1721_v57 }
 0x13f   : > { %2344 = vrot.lane.b32.xlu0 %v3198_v39, %s2716_s2 }
 0x141   : > { %1114 = vperm.xlu1 %2284, %v3176_v32  }
 0x143   : > { %2354 = vrot.lane.b32.xlu0 %v2353_v63, %s2717_s7 }
 0x145   : > { %1134 = vperm.xlu1 %2284, %v3146_v23  }
 0x147   : > { %2364 = vrot.lane.b32.xlu0 %v2363_v1, %s2717_s7 }
 0x149   : > { %2297 = vrot.lane.b32.xlu1 %v3132_v19, %s2716_s2  ;;  %v2338_v19 = vpack.i.bf16 %v1188_v15, %v3137_v21 }
 0x14a   : > { %2311 = vset.pattern.permute.xlu1 %v2719_v48  ;;  %v1196_v48 = vld [vmem:[#allocation8 + $0xf8] sm:$0xff] }
 0x14b   : > { %v2368_v50 = vpack.i.bf16 %v1196_v48, %v3154_v26 }
 0x14d   : > { %2302 = vrot.lane.b32.xlu1 %v2301_v3, %s2717_s7 }
 0x14e   : > { %v2197_v4 = vpop.permute.xlu0 %2196 }
 0x14f   : > { %v2199_v5 = vunpack.i.h.bf16 %v2197_v4  ;;  %v2198_v6 = vunpack.i.l.bf16 %v2197_v4 }
 0x151   : > { %908 = vperm.xlu1 %2311, %v3207_v42   ;;  %v1993_v7 = vpack.c.bf16 %v2199_v5, %v2198_v6 }
 0x153   : > { %1994 = vmatprep.subr.bf16.mxu1 %v1993_v7 }
 0x154   : > { %1996 = vmatpush3.bf16.msra.mxu1 %v1993_v7 }
 0x155   : > { %2312 = vset.pattern.permute.xlu1 %v2718_v46 }
 0x156   : > { %1142 = vperm.xlu1 %2312, %v3207_v42  }
 0x159   : > { %v411_v10 = vpop.permute.xlu1 %410 }
 0x15a   : > { %1146 = vperm.xlu1 %2312, %v442_v53   ;;  %v428_v12 = vadd.f32 %v3266_v9, %v411_v10 }
 0x15c   : > { %v432_v16 = vmul.f32 0.2, %v428_v12 }
 0x15e   : > { %v619_v13 = vpop.permute.xlu1 %618  ;;  %2319 = vrot.lane.b32.xlu1 %v2318_v11, %s2717_s7  ;;  %v436_v29 = vmax.f32 %v428_v12, %v432_v16 }
 0x15f   : > { %v406_v14 = vpop.permute.xlu0 %405  ;;  %v637_v32 = vadd.f32 %v3275_v20, %v619_v13 }
 0x160   : > { %v427_v17 = vadd.f32 %v3266_v9, %v406_v14 }
 0x161   : > { %v641_v42 = vmul.f32 0.2, %v637_v32 }
 0x162   : > { %v2205_v18 = vpop.permute.xlu1 %2204  ;;  %2329 = vrot.lane.b32.xlu1 %v3150_v24, %s2716_s2  ;;  %v431_v22 = vmul.f32 0.2, %v427_v17 }
 0x163   : > { %v2207_v23 = vunpack.i.h.bf16 %v2205_v18  ;;  %v2206_v25 = vunpack.i.l.bf16 %v2205_v18  ;;  %v451_v27 = vpop.permute.xlu0 %450  ;;  %v645_v49 = vmax.f32 %v637_v32, %v641_v42 }
 0x164   : > { %v464_v34 = vsub.f32 %v436_v29, %v451_v27  ;;  %v435_v38 = vmax.f32 %v427_v17, %v431_v22 }
 0x165   : > { %v1997_v31 = vpack.c.bf16 %v2207_v23, %v2206_v25 }
 0x166   : > { %v2210_v35 = vpop.permute.xlu1 %2209  ;;  %2339 = vrot.lane.b32.xlu1 %v2338_v19, %s2717_s7  ;;  %v469_v43 = vmul.f32 1.442695, %v464_v34 }
 0x167   : > { %v2212_v24 = vunpack.i.h.bf16 %v2210_v35  ;;  %v2211_v37 = vunpack.i.l.bf16 %v2210_v35  ;;  %1998 = vmatprep.subr.bf16.mxu1 %v1997_v31  ;;  %v2217_v21 = vpop.permute.xlu0 %2216 }
 0x168   : > { %2000 = vmatpush3.bf16.msra.mxu1 %v1997_v31  ;;  %v2219_v39 = vunpack.i.h.bf16 %v2217_v21  ;;  %v2218_v40 = vunpack.i.l.bf16 %v2217_v21  ;;  %2375 = vpow2.f32 %v469_v43 }
 0x169   : > { %v2001_v41 = vpack.c.bf16 %v2212_v24, %v2211_v37 }
 0x16a   : > { %v2005_v44 = vpack.c.bf16 %v2219_v39, %v2218_v40  ;;  %v446_v45 = vpop.permute.xlu1 %445  ;;  %2349 = vrot.lane.b32.xlu1 %v2348_v36, %s2717_s7 }
 0x16b   : > { %v463_v46 = vsub.f32 %v435_v38, %v446_v45  ;;  %2002 = vmatprep.subr.bf16.mxu1 %v2001_v41  ;;  %v2227_v47 = vpop.permute.xlu0 %2226 }
 0x16c   : > { %2004 = vmatpush3.bf16.msra.mxu1 %v2001_v41  ;;  %v2229_v58 = vunpack.i.h.bf16 %v2227_v47  ;;  %v2228_v59 = vunpack.i.l.bf16 %v2227_v47 }
 0x16d   : > { %v467_v33 = vmul.f32 1.442695, %v463_v46  ;;  %2006 = vmatprep.subr.bf16.mxu1 %v2005_v44 }
 0x16e   : > { %2359 = vrot.lane.b32.xlu1 %v3167_v30, %s2716_s2  ;;  %v2013_v4 = vpack.c.bf16 %v2229_v58, %v2228_v59 }
 0x16f   : > { %2377 = vpow2.f32 %v467_v33  ;;  %v651_v51 = vpop.permute.xlu1 %650  ;;  %v2237_v52 = vpop.permute.xlu0 %2236 }
 0x170   : > { %v665_v53 = vsub.f32 %v645_v49, %v651_v51  ;;  %2008 = vmatpush3.bf16.msra.mxu1 %v2005_v44  ;;  %v2239_v15 = vunpack.i.h.bf16 %v2237_v52  ;;  %v2238_v16 = vunpack.i.l.bf16 %v2237_v52 }
 0x172   : > { %v669_v54 = vmul.f32 1.442695, %v665_v53  ;;  %2369 = vrot.lane.b32.xlu1 %v2368_v50, %s2717_s7  ;;  %v2376_v62 = vpop.eup %2375  ;;  %v2021_v25 = vpack.c.bf16 %v2239_v15, %v2238_v16  ;;  %v3306_v53 = vld [vmem:[%s3066_s18 + $0x8] sm:$0xff]  }
 0x173   : > { %v3285_v55 = vpop.permute.xlu1 %654  ;;  %v3287_v56 = vpop.permute.xlu0 %420  ;;  %v476_v11 = vmul.f32 %v2376_v62, %v3292_v61 }
 0x174   : > { %2379 = vpow2.f32 %v669_v54 }
 0x177   : > { %v2222_v30 = vpop.permute.xlu1 %2221  ;;  %v2244_v26 = vpop.permute.xlu0 %2243 }
 0x178   : > { %v2224_v63 = vunpack.i.h.bf16 %v2222_v30  ;;  %v2223_v0 = vunpack.i.l.bf16 %v2222_v30  ;;  %v2246_v1 = vunpack.i.h.bf16 %v2244_v26  ;;  %v2245_v2 = vunpack.i.l.bf16 %v2244_v26 }
 0x179   : > { %v2378_v3 = vpop.eup %2377 }
 0x17a   : > { %v2009_v5 = vpack.c.bf16 %v2224_v63, %v2223_v0  ;;  %v2025_v6 = vpack.c.bf16 %v2246_v1, %v2245_v2  ;;  %v475_v7 = vmul.f32 %v2378_v3, %v3290_v60 }
 0x17b   : > { %v2232_v8 = vpop.permute.xlu1 %2231  ;;  %v2254_v10 = vpop.permute.xlu0 %2253 }
 0x17c   : > { %v2234_v12 = vunpack.i.h.bf16 %v2232_v8  ;;  %v2233_v13 = vunpack.i.l.bf16 %v2232_v8  ;;  %1841 = vmatprep.mubr.f32.mxu0 %v475_v7  ;;  %2010 = vmatprep.subr.bf16.mxu1 %v2009_v5  ;;  %v2256_v28 = vunpack.i.h.bf16 %v2254_v10  ;;  %v2255_v29 = vunpack.i.l.bf16 %v2254_v10 }
 0x17d   : > { %1842 = vmatmul.mubr.f32.vlgmr.msra.gmra.mrb[0].mxu0 %v476_v11  ;;  %2012 = vmatpush3.bf16.msra.mxu1 %v2009_v5 }
 0x17e   : > { %v2380_v14 = vpop.eup %2379  ;;  %2014 = vmatprep.subr.bf16.mxu1 %v2013_v4  ;;  %2026 = vmatprep.subr.bf16.mxu0 %v2025_v6  ;;  %v2017_v22 = vpack.c.bf16 %v2234_v12, %v2233_v13  ;;  %v1295_v41 = vsel %vm1293_vm0, %v2255_v29, %v2256_v28  ;;  %v430_v12 = vadd.f32 %v3266_v9, %v3287_v56 }
 0x17f   : > { %v416_v17 = vpop.permute.xlu1 %415  ;;  %v456_v18 = vpop.permute.xlu0 %455  ;;  %v677_v19 = vmul.f32 %v2380_v14, %v3290_v60  ;;  %2028 = vmatpush3.bf16.msra.mxu0 %v2025_v6 }
 0x180   : > { %v429_v23 = vadd.f32 %v3266_v9, %v416_v17 }
 0x181   : > { %2016 = vmatpush3.bf16.msra.mxu1 %v2013_v4  ;;  %1879 = vmatprep.mubr.f32.mxu1 %v677_v19  ;;  %v3316_v4 = vld [vmem:[#allocation7 + $0x2] ss:$0 sm:$0xff] }
 0x182   : > { %v433_v27 = vmul.f32 0.2, %v429_v23  ;;  %2018 = vmatprep.subr.bf16.mxu1 %v2017_v22 }
 0x184   : > { %v437_v31 = vmax.f32 %v429_v23, %v433_v27  ;;  %v627_v32 = vpop.permute.xlu1 %626  ;;  %v623_v34 = vpop.permute.xlu0 %622 }
 0x185   : > { %v639_v35 = vadd.f32 %v3275_v20, %v627_v32  ;;  %v638_v36 = vadd.f32 %v3275_v20, %v623_v34  ;;  %2020 = vmatpush3.bf16.msra.mxu1 %v2017_v22 }
 0x186   : > { %v465_v24 = vsub.f32 %v437_v31, %v456_v18  ;;  %2022 = vmatprep.subr.bf16.mxu1 %v2021_v25  ;;  %v3323_v18 = vld [vmem:[#allocation7 + $0x3] ss:$0 sm:$0xff] }
 0x187   : > { %v643_v37 = vmul.f32 0.2, %v639_v35  ;;  %v642_v21 = vmul.f32 0.2, %v638_v36 }
 0x188   : > { %v471_v38 = vmul.f32 1.442695, %v465_v24  ;;  %v2249_v39 = vpop.permute.xlu1 %2248  ;;  %v659_v40 = vpop.permute.xlu0 %658 }
 0x189   : > { %v646_v42 = vmax.f32 %v638_v36, %v642_v21  ;;  %v2251_v43 = vunpack.i.h.bf16 %v2249_v39  ;;  %v2250_v44 = vunpack.i.l.bf16 %v2249_v39  ;;  %v647_v45 = vmax.f32 %v639_v35, %v643_v37  ;;  %2024 = vmatpush3.bf16.msra.mxu1 %v2021_v25 }
 0x18a   : > { %2381 = vpow2.f32 %v471_v38  ;;  %v434_v25 = vmul.f32 0.2, %v430_v12 }
 0x18b   : > { %v666_v46 = vsub.f32 %v646_v42, %v3285_v55  ;;  %v667_v47 = vsub.f32 %v647_v45, %v659_v40  ;;  %v1294_v48 = vsel %vm1293_vm0, %v2250_v44, %v2251_v43  ;;  %v3313_v55 = vunpack.c.l.bf16 %v3306_v53 }
 0x18c   : > { %v631_v33 = vpop.permute.xlu1 %630  ;;  %v2057_v49 = vpack.c.bf16 %v1295_v41, %v1294_v48  ;;  %v438_v36 = vmax.f32 %v430_v12, %v434_v25 }
 0x18d   : > { %v671_v50 = vmul.f32 1.442695, %v666_v46  ;;  %v673_v51 = vmul.f32 1.442695, %v667_v47  ;;  %v3303_v52 = vpop.permute.xlu0 %1102  ;;  %v640_v29 = vadd.f32 %v3275_v20, %v631_v33 }
 0x18e   : > { %2058 = vmatprep.subr.bf16.mxu1 %v2057_v49 }
 0x18f   : > { %2383 = vpow2.f32 %v671_v50  ;;  %v644_v24 = vmul.f32 0.2, %v640_v29 }
 0x190   : > { %2385 = vpow2.f32 %v673_v51 }
 0x191   : > { %v3308_v54 = vpop.permute.xlu1 %872  ;;  %v3310_v57 = vpop.permute.xlu0 %2286  ;;  %v648_v42 = vmax.f32 %v640_v29, %v644_v24 }
 0x194   : > { %v2382_v58 = vpop.eup %2381 }
 0x195   : > { %v2260_v59 = vpop.permute.xlu1 %2259  ;;  %v1139_v30 = vpop.permute.xlu0 %1138  ;;  %v477_v26 = vmul.f32 %v2382_v58, %v3313_v55  ;;  %v3339_v58 = vunpack.c.h.bf16 %v3306_v53  ;;  %v1121_v53 = vadd.f32 %v3323_v18, %v3303_v52 }
 0x196   : > { %v2262_v62 = vunpack.i.h.bf16 %v2260_v59  ;;  %v2261_v63 = vunpack.i.l.bf16 %v2260_v59 }
 0x197   : > { %1844 = vmatprep.mubr.f32.mxu0 %v477_v26 }
 0x198   : > { %v2029_v0 = vpack.c.bf16 %v2262_v62, %v2261_v63 }
 0x199   : > { %v2384_v1 = vpop.eup %2383  ;;  %v2265_v2 = vpop.permute.xlu1 %2264 }
 0x19a   : > { %v2386_v3 = vpop.eup %2385  ;;  %v869_v5 = vpop.permute.xlu0 %868  ;;  %2030 = vmatprep.subr.bf16.mxu0 %v2029_v0  ;;  %v678_v6 = vmul.f32 %v2384_v1, %v3292_v61  ;;  %v2267_v10 = vunpack.i.h.bf16 %v2265_v2  ;;  %v2266_v11 = vunpack.i.l.bf16 %v2265_v2 }
 0x19b   : > { %v887_v7 = vadd.f32 %v3316_v4, %v869_v5  ;;  %2032 = vmatpush3.bf16.msra.mxu0 %v2029_v0  ;;  %v679_v8 = vmul.f32 %v2386_v3, %v3313_v55  ;;  %v2289_v5 = vunpack.i.h.bf16 %v3310_v57 }
 0x19c   : > { %1880 = vmatmul.mubr.f32.vlgmr.msra.gmra.mrb[0].mxu1 %v678_v6  ;;  %v1296_v22 = vsel %vm1293_vm0, %v2266_v11, %v2267_v10  ;;  %v2288_v6 = vunpack.i.l.bf16 %v3310_v57 }
 0x19d   : > { %v891_v13 = vmul.f32 0.2, %v887_v7  ;;  %2060 = vmatpush3.bf16.msra.mxu1 %v2057_v49  ;;  %v2270_v14 = vpop.permute.xlu1 %2269  ;;  %1882 = vmatprep.mubr.f32.mxu1 %v679_v8 }
 0x19e   : > { %v2272_v15 = vunpack.i.h.bf16 %v2270_v14  ;;  %v2271_v16 = vunpack.i.l.bf16 %v2270_v14  ;;  %v881_v17 = vpop.permute.xlu0 %880  ;;  %v1125_v14 = vmul.f32 0.2, %v1121_v53 }
 0x19f   : > { %v895_v19 = vmax.f32 %v887_v7, %v891_v13  ;;  %v890_v31 = vadd.f32 %v3316_v4, %v881_v17 }
 0x1a0   : > { %v1297_v23 = vsel %vm1293_vm0, %v2271_v16, %v2272_v15  ;;  %v1298_v15 = vsel %vm1293_vm0, %v2288_v6, %v2289_v5  ;;  %v1129_v57 = vmax.f32 %v1121_v53, %v1125_v14 }
 0x1a1   : > { %v1107_v27 = vpop.permute.xlu1 %1106  ;;  %v2061_v28 = vpack.c.bf16 %v1297_v23, %v1296_v22  ;;  %v894_v39 = vmul.f32 0.2, %v890_v31 }
 0x1a2   : > { %v1122_v9 = vadd.f32 %v3323_v18, %v1107_v27  ;;  %v901_v56 = vpop.permute.xlu0 %900 }
 0x1a3   : > { %v915_v32 = vsub.f32 %v895_v19, %v901_v56  ;;  %2062 = vmatprep.subr.bf16.mxu1 %v2061_v28  ;;  %v898_v45 = vmax.f32 %v890_v31, %v894_v39 }
 0x1a4   : > { %v1126_v34 = vmul.f32 0.2, %v1122_v9  ;;  %2064 = vmatpush3.bf16.msra.mxu1 %v2061_v28 }
 0x1a5   : > { %v919_v35 = vmul.f32 1.442695, %v915_v32 }
 0x1a6   : > { %v1130_v37 = vmax.f32 %v1122_v9, %v1126_v34  ;;  %v461_v21 = vpop.permute.xlu1 %460  ;;  %v3330_v38 = vpop.permute.xlu0 %904 }
 0x1a7   : > { %v466_v40 = vsub.f32 %v438_v36, %v461_v21  ;;  %2387 = vpow2.f32 %v919_v35 }
 0x1a8   : > { %v3332_v41 = vsub.f32 %v1130_v37, %v1139_v30 }
 0x1a9   : > { %v473_v20 = vmul.f32 1.442695, %v466_v40 }
 0x1aa   : > { %v3334_v43 = vpop.permute.xlu0 %2307 }
 0x1ab   : > { %2389 = vpow2.f32 %v473_v20  ;;  %v663_v44 = vpop.permute.xlu1 %662  ;;  %v2310_v31 = vunpack.i.h.bf16 %v3334_v43  ;;  %v2309_v32 = vunpack.i.l.bf16 %v3334_v43 }
 0x1ac   : > { %v668_v46 = vsub.f32 %v648_v42, %v663_v44 }
 0x1ad   : > { %v1301_v39 = vsel %vm1293_vm0, %v2309_v32, %v2310_v31  ;;  %v1155_v31 = vmul.f32 1.442695, %v3332_v41 }
 0x1ae   : > { %v675_v47 = vmul.f32 1.442695, %v668_v46  ;;  %v913_v48 = vpop.permute.xlu0 %912 }
 0x1af   : > { %v918_v33 = vsub.f32 %v898_v45, %v913_v48  ;;  %v888_v45 = vadd.f32 %v3316_v4, %v3308_v54 }
 0x1b0   : > { %2391 = vpow2.f32 %v675_v47  ;;  %v3336_v49 = vpop.permute.xlu1 %876 }
 0x1b1   : > { %v925_v50 = vmul.f32 1.442695, %v918_v33  ;;  %v2388_v51 = vpop.eup %2387  ;;  %v889_v46 = vadd.f32 %v3316_v4, %v3336_v49  ;;  %v892_v33 = vmul.f32 0.2, %v888_v45 }
 0x1b2   : > { %v927_v63 = vmul.f32 %v2388_v51, %v3290_v60  ;;  %v2315_v23 = vpop.permute.xlu0 %2314 }
 0x1b3   : > { %2393 = vpow2.f32 %v925_v50  ;;  %v2317_v27 = vunpack.i.h.bf16 %v2315_v23  ;;  %v2316_v28 = vunpack.i.l.bf16 %v2315_v23  ;;  %v893_v50 = vmul.f32 0.2, %v889_v46 }
 0x1b4   : > { %v2281_v59 = vpop.permute.xlu1 %2280 }
 0x1b5   : > { %v2390_v30 = vpop.eup %2389  ;;  %v2283_v26 = vunpack.i.h.bf16 %v2281_v59  ;;  %v2282_v62 = vunpack.i.l.bf16 %v2281_v59  ;;  %v2041_v35 = vpack.c.bf16 %v2317_v27, %v2316_v28 }
 0x1b6   : > { %v478_v0 = vmul.f32 %v2390_v30, %v3339_v58  ;;  %v2325_v42 = vpop.permute.xlu0 %2324 }
 0x1b7   : > { %v2033_v1 = vpack.c.bf16 %v2283_v26, %v2282_v62  ;;  %v2327_v59 = vunpack.i.h.bf16 %v2325_v42  ;;  %v2326_v30 = vunpack.i.l.bf16 %v2325_v42 }
 0x1b8   : > { %v3343_v2 = vpop.permute.xlu1 %1110  ;;  %1845 = vmatmul.mubr.f32.gmra.mrb[2].mxu0 %v478_v0 }
 0x1b9   : > { %2034 = vmatprep.subr.bf16.mxu0 %v2033_v1  ;;  %1917 = vmatprep.mubr.f32.mxu0 %v927_v63  ;;  %v1123_v26 = vadd.f32 %v3323_v18, %v3343_v2  ;;  %v896_v63 = vmax.f32 %v888_v45, %v892_v33  ;;  %v1303_v4 = vsel %vm1293_vm0, %v2326_v30, %v2327_v59 }
 0x1ba   : > { %v2392_v3 = vpop.eup %2391  ;;  %2036 = vmatpush3.bf16.msra.mxu0 %v2033_v1  ;;  %v2335_v48 = vpop.permute.xlu0 %2334 }
 0x1bb   : > { %v680_v7 = vmul.f32 %v2392_v3, %v3339_v58  ;;  %v916_v49 = vsub.f32 %v896_v63, %v3330_v38  ;;  %v1127_v53 = vmul.f32 0.2, %v1123_v26  ;;  %v2337_v2 = vunpack.i.h.bf16 %v2335_v48 }
 0x1bc   : > { %v2292_v8 = vpop.permute.xlu1 %2291 }
 0x1bd   : > { %v2394_v10 = vpop.eup %2393  ;;  %v2294_v11 = vunpack.i.h.bf16 %v2292_v8  ;;  %v2293_v12 = vunpack.i.l.bf16 %v2292_v8  ;;  %1883 = vmatmul.mubr.f32.gmra.mrb[2].mxu1 %v680_v7 }
 0x1be   : > { %v3351_v13 = vmul.f32 %v2394_v10, %v3339_v58  ;;  %v2345_v62 = vpop.permute.xlu0 %2344 }
 0x1bf   : > { %v1299_v16 = vsel %vm1293_vm0, %v2293_v12, %v2294_v11  ;;  %v2347_v7 = vunpack.i.h.bf16 %v2345_v62  ;;  %v2346_v8 = vunpack.i.l.bf16 %v2345_v62  ;;  %v2336_v11 = vunpack.i.l.bf16 %v2335_v48 }
 0x1c0   : > { %v1115_v52 = vpop.permute.xlu1 %1114  ;;  %v2065_v17 = vpack.c.bf16 %v1299_v16, %v1298_v15 }
 0x1c1   : > { %v1124_v54 = vadd.f32 %v3323_v18, %v1115_v52  ;;  %v921_v52 = vmul.f32 1.442695, %v916_v49  ;;  %v2049_v38 = vpack.c.bf16 %v2347_v7, %v2346_v8  ;;  %v1304_v27 = vsel %vm1293_vm0, %v2336_v11, %v2337_v2 }
 0x1c2   : > { %2066 = vmatprep.subr.bf16.mxu1 %v2065_v17  ;;  %v2355_v18 = vpop.permute.xlu0 %2354 }
 0x1c3   : > { %2068 = vmatpush3.bf16.msra.mxu1 %v2065_v17  ;;  %v1128_v14 = vmul.f32 0.2, %v1124_v54  ;;  %v1131_v17 = vmax.f32 %v1123_v26, %v1127_v53 }
 0x1c4   : > { %v1135_v19 = vpop.permute.xlu1 %1134 }
 0x1c5   : > { %v1149_v22 = vsub.f32 %v1129_v57, %v1135_v19  ;;  %v1132_v28 = vmax.f32 %v1124_v54, %v1128_v14 }
 0x1c7   : > { %v1153_v25 = vmul.f32 1.442695, %v1149_v22 }
 0x1c8   : > { %v2298_v29 = vpop.permute.xlu1 %2297 }
 0x1c9   : > { %2395 = vpow2.f32 %v1153_v25  ;;  %v2300_v9 = vunpack.i.h.bf16 %v2298_v29  ;;  %v2299_v56 = vunpack.i.l.bf16 %v2298_v29  ;;  %v2357_v25 = vunpack.i.h.bf16 %v2355_v18 }
 0x1ca   : > { %2397 = vpow2.f32 %v921_v52 }
 0x1cb   : > { %v2037_v34 = vpack.c.bf16 %v2300_v9, %v2299_v56  ;;  %v2356_v56 = vunpack.i.l.bf16 %v2355_v18 }
 0x1cc   : > { %v2303_v36 = vpop.permute.xlu1 %2302 }
 0x1cd   : > { %v2305_v24 = vunpack.i.h.bf16 %v2303_v36  ;;  %v2304_v37 = vunpack.i.l.bf16 %v2303_v36  ;;  %2038 = vmatprep.subr.bf16.mxu0 %v2037_v34 }
 0x1ce   : > { %2040 = vmatpush3.bf16.msra.mxu0 %v2037_v34 }
 0x1cf   : > { %v1300_v21 = vsel %vm1293_vm0, %v2304_v37, %v2305_v24  ;;  %2042 = vmatprep.subr.bf16.mxu0 %v2041_v35 }
 0x1d0   : > { %v909_v40 = vpop.permute.xlu1 %908  ;;  %v2069_v20 = vpack.c.bf16 %v1301_v39, %v1300_v21  ;;  %v1307_v39 = vsel %vm1293_vm0, %v2356_v56, %v2357_v25 }
 0x1d2   : > { %2070 = vmatprep.subr.bf16.mxu1 %v2069_v20  ;;  %2044 = vmatpush3.bf16.msra.mxu0 %v2041_v35 }
 0x1d3   : > { %v2396_v44 = vpop.eup %2395  ;;  %2072 = vmatpush3.bf16.msra.mxu1 %v2069_v20 }
 0x1d4   : > { %v1161_v43 = vmul.f32 %v2396_v44, %v3290_v60  ;;  %v897_v60 = vmax.f32 %v889_v46, %v893_v50  ;;  %v2398_v33 = vpop.eup %2397 }
 0x1d5   : > { %v1143_v47 = vpop.permute.xlu1 %1142  ;;  %v928_v62 = vmul.f32 %v2398_v33, %v3292_v61 }
 0x1d6   : > { %1955 = vmatprep.mubr.f32.mxu1 %v1161_v43  ;;  %v917_v5 = vsub.f32 %v897_v60, %v909_v40  ;;  %v1151_v22 = vsub.f32 %v1131_v17, %v1143_v47  ;;  %v2365_v40 = vpop.permute.xlu0 %2364  ;;  %v2720_v60 = vmov 32  }
 0x1d7   : > { %v2367_v46 = vunpack.i.h.bf16 %v2365_v40  ;;  %v2366_v47 = vunpack.i.l.bf16 %v2365_v40  ;;  %2373 = vset.pattern.permute.xlu1 %v2720_v60  ;;  %2374 = vset.pattern.permute.xlu0 %v2720_v60 }
 0x1d8   : > { %v923_v57 = vmul.f32 1.442695, %v917_v5  ;;  %v1157_v35 = vmul.f32 1.442695, %v1151_v22 }
 0x1d9   : > { %v1147_v51 = vpop.permute.xlu1 %1146  ;;  %v1308_v26 = vsel %vm1293_vm0, %v2366_v47, %v2367_v46 }
 0x1da   : > { %2399 = vpow2.f32 %v923_v57  ;;  %v1152_v32 = vsub.f32 %v1132_v28, %v1147_v51 }
 0x1db   : > { %2401 = vpow2.f32 %v1155_v31 }
 0x1dc   : > { %v1159_v20 = vmul.f32 1.442695, %v1152_v32  ;;  %2403 = vpow2.f32 %v1157_v35 }
 0x1dd   : > { %v2320_v0 = vpop.permute.xlu1 %2319 }
 0x1de   : > { %v2322_v1 = vunpack.i.h.bf16 %v2320_v0  ;;  %v2321_v3 = vunpack.i.l.bf16 %v2320_v0  ;;  %2405 = vpow2.f32 %v1159_v20 }
 0x1e0   : > { %v1302_v6 = vsel %vm1293_vm0, %v2321_v3, %v2322_v1 }
 0x1e1   : > { %v2330_v10 = vpop.permute.xlu1 %2329  ;;  %v2073_v12 = vpack.c.bf16 %v1303_v4, %v1302_v6 }
 0x1e2   : > { %v2332_v15 = vunpack.i.h.bf16 %v2330_v10  ;;  %v2331_v16 = vunpack.i.l.bf16 %v2330_v10 }
 0x1e3   : > { %2074 = vmatprep.subr.bf16.mxu1 %v2073_v12 }
 0x1e4   : > { %v2045_v19 = vpack.c.bf16 %v2332_v15, %v2331_v16  ;;  %2076 = vmatpush3.bf16.msra.mxu1 %v2073_v12  ;;  %v2400_v51 = vpop.eup %2399 }
 0x1e5   : > { %v2340_v23 = vpop.permute.xlu1 %2339  ;;  %v929_v0 = vmul.f32 %v2400_v51, %v3313_v55  ;;  %v2402_v1 = vpop.eup %2401 }
 0x1e6   : > { %v2342_v29 = vunpack.i.h.bf16 %v2340_v23  ;;  %v2341_v9 = vunpack.i.l.bf16 %v2340_v23  ;;  %2046 = vmatprep.subr.bf16.mxu0 %v2045_v19  ;;  %v2404_v3 = vpop.eup %2403  ;;  %v1162_v4 = vmul.f32 %v2402_v1, %v3292_v61 }
 0x1e7   : > { %2048 = vmatpush3.bf16.msra.mxu0 %v2045_v19  ;;  %v1163_v53 = vmul.f32 %v2404_v3, %v3313_v55 }
 0x1e8   : > { %v1305_v34 = vsel %vm1293_vm0, %v2341_v9, %v2342_v29  ;;  %2050 = vmatprep.subr.bf16.mxu0 %v2049_v38  ;;  %v2406_v49 = vpop.eup %2405 }
 0x1e9   : > { %v2350_v36 = vpop.permute.xlu1 %2349  ;;  %v2077_v24 = vpack.c.bf16 %v1305_v34, %v1304_v27  ;;  %v1164_v5 = vmul.f32 %v2406_v49, %v3339_v58 }
 0x1ea   : > { %v2352_v37 = vunpack.i.h.bf16 %v2350_v36  ;;  %v2351_v21 = vunpack.i.l.bf16 %v2350_v36 }
 0x1eb   : > { %2078 = vmatprep.subr.bf16.mxu1 %v2077_v24  ;;  %2052 = vmatpush3.bf16.msra.mxu0 %v2049_v38 }
 0x1ec   : > { %2080 = vmatpush3.bf16.msra.mxu1 %v2077_v24  ;;  %v1306_v41 = vsel %vm1293_vm0, %v2351_v21, %v2352_v37 }
 0x1ed   : > { %v2360_v42 = vpop.permute.xlu1 %2359  ;;  %v2081_v44 = vpack.c.bf16 %v1307_v39, %v1306_v41 }
 0x1ee   : > { %v2362_v43 = vunpack.i.h.bf16 %v2360_v42  ;;  %v2361_v45 = vunpack.i.l.bf16 %v2360_v42 }
 0x1ef   : > { %2082 = vmatprep.subr.bf16.mxu1 %v2081_v44 }
 0x1f0   : > { %v2053_v48 = vpack.c.bf16 %v2362_v43, %v2361_v45  ;;  %2084 = vmatpush3.bf16.msra.mxu1 %v2081_v44 }
 0x1f1   : > { %v2370_v50 = vpop.permute.xlu1 %2369 }
 0x1f2   : > { %v2372_v59 = vunpack.i.h.bf16 %v2370_v50  ;;  %v2371_v30 = vunpack.i.l.bf16 %v2370_v50  ;;  %2054 = vmatprep.subr.bf16.mxu0 %v2053_v48 }
 0x1f3   : > { %2056 = vmatpush3.bf16.msra.mxu0 %v2053_v48 }
 0x1f4   : > { %v1309_v63 = vsel %vm1293_vm0, %v2371_v30, %v2372_v59 }
 0x1f5   : > { %v2085_v54 = vpack.c.bf16 %v1309_v63, %v1308_v26 }
 0x1f6   : > { %1918 = vmatmul.mubr.f32.vlgmr.msra.gmra.mrb[4].mxu0 %v928_v62 }
 0x1f7   : > { %1920 = vmatprep.mubr.f32.mxu0 %v929_v0  ;;  %2086 = vmatprep.subr.bf16.mxu1 %v2085_v54 }
 0x1f8   : > { %2088 = vmatpush3.bf16.msra.mxu1 %v2085_v54 }
 0x1fa   : > { %1921 = vmatmul.mubr.f32.gmra.mrb[6].mxu0 %v3351_v13 }
 0x1fb   : > { %1956 = vmatmul.mubr.f32.vlgmr.msra.gmra.mrb[4].mxu1 %v1162_v4 }
 0x1fc   : > { %1958 = vmatprep.mubr.f32.mxu1 %v1163_v53 }
 0x1ff   : > { %1959 = vmatmul.mubr.f32.gmra.mrb[6].mxu1 %v1164_v5 }
 0x250   : > { %v3383_v6 = vpop.f32.mrb[0].mxu0 }
 0x251   : > { %v3385_v7 = vpop.f32.mrb[1].mxu0  ;;  %vm581_vm13 = vcmp.gt.f32.partialorder %v3383_v6, 0.0 }
 0x252   : > { %vm580_vm14 = vcmp.gt.f32.partialorder %v3385_v7, 0.0  ;;  %v585_v37 = vsel %vm581_vm13, %v3383_v6, 1.0 }
 0x253   : > { %v584_v39 = vsel %vm580_vm14, %v3385_v7, 1.0 }
 0x26f   : > { %v3387_v8 = vpop.f32.mrb[0].mxu1 }
 0x270   : > { %vm831_vm1 = vcmp.gt.f32.partialorder %v3387_v8, 0.0  ;;  %v3390_v10 = vpop.f32.mrb[1].mxu1 }
 0x271   : > { %v835_v61 = vsel %vm831_vm1, %v3387_v8, 1.0  ;;  %vm830_vm2 = vcmp.gt.f32.partialorder %v3390_v10, 0.0  ;;  %vm1495_vm1 = vcmask 261120  }
 0x272   : > { %2407 = vrcp.f32 %v835_v61  ;;  %v834_v55 = vsel %vm830_vm2, %v3390_v10, 1.0  ;;  %vm1500_vm2 = vcmask 523264  }
 0x273   : > { %2409 = vrcp.f32 %v834_v55 }
 0x27c   : > { %v2408_v58 = vpop.eup %2407 }
 0x27d   : > { %v2410_v13 = vpop.eup %2409  ;;  %849 = vperm.xlu1 %2373, %v2408_v58  }
 0x27e   : > { %844 = vperm.xlu0 %2374, %v2410_v13  }
 0x28b   : > { %v3395_v2 = vpop.f32.mrb[2].mxu0 }
 0x28c   : > { %v3397_v11 = vpop.f32.mrb[3].mxu0  ;;  %vm583_vm15 = vcmp.gt.f32.partialorder %v3395_v2, 0.0 }
 0x28d   : > { %vm582_vm0 = vcmp.gt.f32.partialorder %v3397_v11, 0.0  ;;  %v587_v20 = vsel %vm583_vm15, %v3395_v2, 1.0 }
 0x28e   : > { %v586_v42 = vsel %vm582_vm0, %v3397_v11, 1.0 }
 0x290   : > { %v3399_v12 = vpop.f32.mrb[2].mxu1 }
 0x291   : > { %vm833_vm3 = vcmp.gt.f32.partialorder %v3399_v12, 0.0  ;;  %v3402_v14 = vpop.f32.mrb[3].mxu1 }
 0x292   : > { %v837_v15 = vsel %vm833_vm3, %v3399_v12, 1.0  ;;  %vm832_vm4 = vcmp.gt.f32.partialorder %v3402_v14, 0.0  ;;  %vm1505_vm3 = vcmask 785408  }
 0x293   : > { %2411 = vrcp.f32 %v837_v15  ;;  %v836_v16 = vsel %vm832_vm4, %v3402_v14, 1.0 }
 0x294   : > { %2413 = vrcp.f32 %v836_v16 }
 0x29d   : > { %v2412_v18 = vpop.eup %2411 }
 0x29e   : > { %v2414_v52 = vpop.eup %2413  ;;  %859 = vperm.xlu0 %2374, %v2412_v18  }
 0x29f   : > { %854 = vperm.xlu1 %2373, %v2414_v52  }
 0x2c9   : > { %v3407_v17 = vpop.f32.mrb[4].mxu0 }
 0x2ca   : > { %vm1065_vm5 = vcmp.gt.f32.partialorder %v3407_v17, 0.0  ;;  %v3410_v57 = vpop.f32.mrb[5].mxu0 }
 0x2cb   : > { %v1069_v19 = vsel %vm1065_vm5, %v3407_v17, 1.0  ;;  %vm1064_vm6 = vcmp.gt.f32.partialorder %v3410_v57, 0.0 }
 0x2cc   : > { %2415 = vrcp.f32 %v1069_v19  ;;  %v1068_v38 = vsel %vm1064_vm6, %v3410_v57, 1.0 }
 0x2cd   : > { %2417 = vrcp.f32 %v1068_v38  ;;  %v3415_v22 = vpop.f32.mrb[6].mxu0 }
 0x2ce   : > { %v3417_v23 = vpop.f32.mrb[7].mxu0  ;;  %v3419_v25 = vpop.f32.mrb[4].mxu1  ;;  %vm1067_vm8 = vcmp.gt.f32.partialorder %v3415_v22, 0.0 }
 0x2cf   : > { %vm1412_vm7 = vcmp.gt.f32.partialorder %v3419_v25, 0.0  ;;  %v3422_v27 = vpop.f32.mrb[5].mxu1  ;;  %vm1066_vm10 = vcmp.gt.f32.partialorder %v3417_v23, 0.0  ;;  %v1071_v56 = vsel %vm1067_vm8, %v3415_v22, 1.0 }
 0x2d0   : > { %v1416_v28 = vsel %vm1412_vm7, %v3419_v25, 1.0  ;;  %vm1411_vm9 = vcmp.gt.f32.partialorder %v3422_v27, 0.0  ;;  %v1070_v32 = vsel %vm1066_vm10, %v3417_v23, 1.0 }
 0x2d1   : > { %v1415_v29 = vsel %vm1411_vm9, %v3422_v27, 1.0  ;;  %2419 = vrcp.f32 %v1416_v28 }
 0x2d2   : > { %v3429_v9 = vpop.f32.mrb[6].mxu1  ;;  %2421 = vrcp.f32 %v1415_v29  ;;  %v1710_v29 = vld [vmem:[#allocation11] ss:$0 sm:$0xff] }
 0x2d3   : > { %v3432_v31 = vpop.f32.mrb[7].mxu1  ;;  %vm1414_vm11 = vcmp.gt.f32.partialorder %v3429_v9, 0.0  ;;  %2423 = vrcp.f32 %v1071_v56 }
 0x2d4   : > { %vm1413_vm12 = vcmp.gt.f32.partialorder %v3432_v31, 0.0  ;;  %2425 = vrcp.f32 %v1070_v32  ;;  %v1418_v36 = vsel %vm1414_vm11, %v3429_v9, 1.0 }
 0x2d5   : > { %v1417_v24 = vsel %vm1413_vm12, %v3432_v31, 1.0  ;;  %2427 = vrcp.f32 %v1418_v36 }
 0x2d6   : > { %v2416_v34 = vpop.eup %2415  ;;  %2429 = vrcp.f32 %v1417_v24 }
 0x2d7   : > { %v2418_v35 = vpop.eup %2417  ;;  %1083 = vperm.xlu0 %2374, %v2416_v34   ;;  %2431 = vrcp.f32 %v585_v37 }
 0x2d8   : > { %1078 = vperm.xlu1 %2373, %v2418_v35   ;;  %2433 = vrcp.f32 %v584_v39 }
 0x2d9   : > { %2435 = vrcp.f32 %v587_v20 }
 0x2da   : > { %2437 = vrcp.f32 %v586_v42 }
 0x2db   : > { %v2420_v21 = vpop.eup %2419 }
 0x2dc   : > { %v2422_v40 = vpop.eup %2421  ;;  %1430 = vperm.xlu0 %2374, %v2420_v21  }
 0x2dd   : > { %1425 = vperm.xlu1 %2373, %v2422_v40   ;;  %v2424_v41 = vpop.eup %2423 }
 0x2de   : > { %v2426_v44 = vpop.eup %2425 }
 0x2df   : > { %v2428_v43 = vpop.eup %2427 }
 0x2e0   : > { %1093 = vperm.xlu0 %2374, %v2424_v41   ;;  %v2430_v45 = vpop.eup %2429 }
 0x2e1   : > { %1088 = vperm.xlu1 %2373, %v2426_v44   ;;  %v2432_v46 = vpop.eup %2431 }
 0x2e2   : > { %v2434_v47 = vpop.eup %2433 }
 0x2e3   : > { %v2436_v48 = vpop.eup %2435 }
 0x2e4   : > { %1440 = vperm.xlu0 %2374, %v2428_v43   ;;  %v2438_v33 = vpop.eup %2437 }
 0x2e5   : > { %1435 = vperm.xlu1 %2373, %v2430_v45  }
 0x2e8   : > { %599 = vperm.xlu0 %2374, %v2432_v46  }
 0x2e9   : > { %594 = vperm.xlu1 %2373, %v2434_v47  }
 0x2ec   : > { %609 = vperm.xlu0 %2374, %v2436_v48  }
 0x2ed   : > { %604 = vperm.xlu1 %2373, %v2438_v33  }
 0x2fc   : > { %v850_v50 = vpop.permute.xlu1 %849 }
 0x2fd   : > { %v863_v51 = vmul.f32 %v3387_v8, %v850_v50  ;;  %v845_v59 = vpop.permute.xlu0 %844 }
 0x2fe   : > { %v862_v30 = vmul.f32 %v845_v59, %v3390_v10 }
 0x2ff   : > { %1453 = vrot.lane.b32.xlu0 %v863_v51, %s2721_s30 }
 0x300   : > { %1451 = vrot.lane.b32.xlu1 %v862_v30, %s2721_s30 }
 0x31d   : > { %v860_v26 = vpop.permute.xlu0 %859 }
 0x31e   : > { %v865_v62 = vmul.f32 %v3399_v12, %v860_v26  ;;  %v855_v63 = vpop.permute.xlu1 %854 }
 0x31f   : > { %v864_v60 = vmul.f32 %v855_v63, %v3402_v14 }
 0x320   : > { %1457 = vrot.lane.b32.xlu0 %v865_v62, %s2721_s30 }
 0x321   : > { %1455 = vrot.lane.b32.xlu1 %v864_v60, %s2721_s30 }
 0x356   : > { %v1084_v0 = vpop.permute.xlu0 %1083 }
 0x357   : > { %v1097_v54 = vmul.f32 %v3407_v17, %v1084_v0  ;;  %v1079_v1 = vpop.permute.xlu1 %1078 }
 0x358   : > { %v1096_v3 = vmul.f32 %v1079_v1, %v3410_v57 }
 0x359   : > { %1469 = vrot.lane.b32.xlu0 %v1097_v54, %s2722_s0 }
 0x35a   : > { %1467 = vrot.lane.b32.xlu1 %v1096_v3, %s2722_s0 }
 0x35b   : > { %v1431_v4 = vpop.permute.xlu0 %1430 }
 0x35c   : > { %v1444_v49 = vmul.f32 %v3419_v25, %v1431_v4  ;;  %v1426_v53 = vpop.permute.xlu1 %1425 }
 0x35d   : > { %v1443_v5 = vmul.f32 %v1426_v53, %v3422_v27 }
 0x35e   : > { %1485 = vrot.lane.b32.xlu0 %v1444_v49, %s2723_s17 }
 0x35f   : > { %v1094_v8 = vpop.permute.xlu0 %1093  ;;  %1483 = vrot.lane.b32.xlu1 %v1443_v5, %s2723_s17 }
 0x360   : > { %v1099_v10 = vmul.f32 %v3415_v22, %v1094_v8  ;;  %v1089_v61 = vpop.permute.xlu1 %1088 }
 0x361   : > { %v1098_v55 = vmul.f32 %v1089_v61, %v3417_v23 }
 0x362   : > { %1473 = vrot.lane.b32.xlu0 %v1099_v10, %s2722_s0 }
 0x363   : > { %v1441_v58 = vpop.permute.xlu0 %1440  ;;  %1471 = vrot.lane.b32.xlu1 %v1098_v55, %s2722_s0 }
 0x364   : > { %v1446_v13 = vmul.f32 %v3429_v9, %v1441_v58  ;;  %v1436_v12 = vpop.permute.xlu1 %1435 }
 0x365   : > { %v1445_v14 = vmul.f32 %v1436_v12, %v3432_v31 }
 0x366   : > { %1489 = vrot.lane.b32.xlu0 %v1446_v13, %s2723_s17 }
 0x367   : > { %1487 = vrot.lane.b32.xlu1 %v1445_v14, %s2723_s17  ;;  %v600_v15 = vpop.permute.xlu0 %599 }
 0x368   : > { %v595_v16 = vpop.permute.xlu1 %594  ;;  %v613_v25 = vmul.f32 %v3383_v6, %v600_v15 }
 0x369   : > { %v612_v27 = vmul.f32 %v595_v16, %v3385_v7 }
 0x36b   : > { %v610_v18 = vpop.permute.xlu0 %609 }
 0x36c   : > { %v605_v52 = vpop.permute.xlu1 %604  ;;  %v615_v37 = vmul.f32 %v3395_v2, %v610_v18 }
 0x36d   : > { %v614_v39 = vmul.f32 %v605_v52, %v3397_v11 }
 0x371   : > { %v1454_v17 = vpop.permute.xlu0 %1453 }
 0x372   : > { %v1452_v57 = vpop.permute.xlu1 %1451  ;;  %v1497_v28 = vsel %vm1495_vm1, %v613_v25, %v1454_v17 }
 0x373   : > { %v1496_v9 = vsel %vm1495_vm1, %v612_v27, %v1452_v57 }
 0x392   : > { %v1458_v19 = vpop.permute.xlu0 %1457 }
 0x393   : > { %v1456_v38 = vpop.permute.xlu1 %1455  ;;  %v1499_v40 = vsel %vm1495_vm1, %v615_v37, %v1458_v19 }
 0x394   : > { %v1498_v20 = vsel %vm1495_vm1, %v614_v39, %v1456_v38 }
 0x3cb   : > { %v1470_v22 = vpop.permute.xlu0 %1469 }
 0x3cc   : > { %v1468_v23 = vpop.permute.xlu1 %1467  ;;  %v1502_v56 = vsel %vm1500_vm2, %v1497_v28, %v1470_v22 }
 0x3cd   : > { %v1501_v32 = vsel %vm1500_vm2, %v1496_v9, %v1468_v23 }
 0x3d0   : > { %v1486_v31 = vpop.permute.xlu0 %1485 }
 0x3d1   : > { %v1507_v34 = vsel %vm1505_vm3, %v1502_v56, %v1486_v31  ;;  %v1484_v35 = vpop.permute.xlu1 %1483 }
 0x3d2   : > { %v1518_v36 = vadd.f32 %v1710_v29, %v1507_v34  ;;  %v1506_v6 = vsel %vm1505_vm3, %v1501_v32, %v1484_v35 }
 0x3d3   : > { %v1517_v24 = vadd.f32 %v1710_v29, %v1506_v6 }
 0x3d4   : > { %1522 = vst [vmem:[%s385_s11 + $0x8] sm:$0xff] %v1518_v36  ;;  %v1474_v7 = vpop.permute.xlu0 %1473 }
 0x3d5   : > { %1521 = vst [vmem:[%s385_s11] sm:$0xff] %v1517_v24  ;;  %v1472_v21 = vpop.permute.xlu1 %1471  ;;  %v1504_v41 = vsel %vm1500_vm2, %v1499_v40, %v1474_v7 }
 0x3d6   : > { %v1503_v2 = vsel %vm1500_vm2, %v1498_v20, %v1472_v21 }
 0x3d8   : > { %v1490_v42 = vpop.permute.xlu0 %1489 }
 0x3d9   : > { %v1509_v44 = vsel %vm1505_vm3, %v1504_v41, %v1490_v42  ;;  %v1488_v11 = vpop.permute.xlu1 %1487 }
 0x3da   : > { %v1520_v43 = vadd.f32 %v1710_v29, %v1509_v44  ;;  %v1508_v45 = vsel %vm1505_vm3, %v1503_v2, %v1488_v11 }
 0x3db   : > { %v1519_v46 = vadd.f32 %v1710_v29, %v1508_v45 }
 0x3dc   : > { %1524 = vst [vmem:[%s385_s11 + $0x18] sm:$0xff] %v1520_v43 }
 0x3dd   : > { %1523 = vst [vmem:[%s385_s11 + $0x10] sm:$0xff] %v1519_v46 }
 0x3de   : > { %2626 = shalt.err (!%p2623_p4)
}
 0x3df   : > { %s2627_s29 = scalar_lea.hbm %s3482_s14, 512  ;;  %s2631_s18 = scalar_lea.hbm %s3590_s10, 2048 }
 0x3e0   : > { %p2628_p6 = scmp.ne.s32.totalorder %s3482_s14, %s2627_s29  ;;  %p2632_p13 = scmp.lt.u32.totalorder %s3482_s14, %s3590_s10 }
 0x3e1   : > { %p2633_p10 = scmp.lt.u32.totalorder %s2631_s18, %s2627_s29  ;;  %p2635_p0 = scmp.lt.u32.totalorder %s2627_s29, %s3482_s14 }
 0x3e2   : > { %p2629_p7 = pnand %p2628_p6, %p3591_p9 }
 0x3e3   : > { %p2634_p12 = por %p2633_p10, %p2632_p13 }
 0x3e4   : > { %p2630_p11 = pneg %p2629_p7 }
 0x3e5   : > { %p2636_p2 = por %p2635_p0, %p2634_p12 }
 0x3e7   : > { %p2637_p1 = pnand %p2636_p2, %p2630_p11 }
 0x3e9   : > { %2640 = shalt.err (!%p2637_p1)
}
 0x3ea   : > { %s2725_s7 = smov 128   ;;  %s2726_s30 = smov 8  }
 0x3eb   : > { %2107 = dma.vmem_to_hbm [thread:$0]  (%p3591_p9), %s3474_s26, 512, %s3482_s14, %s1526_s6, %s2725_s7, %s2725_s7, %s2726_s30  }
 0x3ec PF: > { %s3592_s0 = sld [smem:[#allocation20_spill]]  ;;  %s3593_s17 = sld [smem:[#allocation21_spill]] }
 0x3ed   : > { %p2140_p8 = scmp.ge.s32.totalorder %s2699_s24, 2 }
 0x3f2   : > { %s1554_s11 = sand.u32 1, %s3592_s0   ;;  %p3594_p3 = scmp.ne.s32.totalorder %s3593_s17, 0 }
 0x3f3   : > { %s1555_s16 = scalar_lea.sflag [#allocation4], %s1554_s11 }
 0x3f4   : > { %p2130_p5 = pnand %p2140_p8, %p3594_p3 }
 0x3f6   : > { %2682 = dma.done.wait (!%p2130_p5), %s1555_s16, 512  }
 0x3f7   : > { %2684 = vsyncadd (!%p2130_p5), %s1555_s16, 4294966784  ;;  %s3595_s24 = sld [smem:[#allocation22_spill]]  ;;  %s3596_s25 = sld [smem:[#allocation23_spill]] }
 0x3f8   : > { %s3597_s21 = smov %s2691_s22  ;;  %s3598_s22 = smov %s2695_s23 }
 0x3fd   : > { %p23_p4 = scmp.ge.s32.totalorder %s3595_s24, 6   ;;  %s3599_s23 = smov %s3596_s25 }
 0x3ff   :  { %25 = sbr.rel (!%p23_p4) target bundleno = 13 (0xd), region = 125 }
 0x406   :  { %1560 = vsyncpa [#allocation3], 1 }
 0x407   :  { %1562 = vsyncpa [#allocation3 + $0x1], 1 }
 0x408   :  { %1563 = vsyncpa [#allocation6], 1 }
 0x409   :  { %1565 = vsyncpa [#allocation6 + $0x1], 1 }
 0x40a   :  { %1566 = vsyncpa [#allocation9], 1 }
 0x40b   :  { %1567 = vsyncpa [#allocation4], 1 }
 0x40c   :  { %1569 = vsyncpa [#allocation4 + $0x1], 1 }

</bundles_post_ra>
